<compile_context>
chip_gen: v7x
topology: tpu7x:2x2x1
jax: 0.10.0
libtpu: 0.0.40
codegen_flags: <defaults>
</compile_context>

<pallas_src>
import jax
import jax.numpy as jnp
import numpy as np
from jax import lax
from jax.experimental import pallas as pl
from jax.experimental.pallas import tpu as pltpu


def _self_attention_kernel(x_ref, wq_ref, wk_ref, wv_ref,
                           bq_ref, bk_ref, bv_ref, g_ref, o_ref):
    # x_ref : (1, C, N) bf16  -- native NCHW-flat layout, lane dim = N (dense)
    # wq/wk : (C8, C) bf16, wv: (C, C) bf16
    # bq/bk : (C8, 1) f32,  bv: (C, 1) f32
    # g_ref : (1, 1) f32 scalar in SMEM
    # o_ref : (1, C, N) f32  -- gamma * attention output, channel-major (lane dense)
    x = x_ref[0]                                                           # (C, N) bf16

    # 1x1 convolutions == channel matmuls in channel-major layout (bf16 in, f32 acc).
    q = jnp.dot(wq_ref[...], x, preferred_element_type=jnp.float32) + bq_ref[...]  # (C8, N)
    k = jnp.dot(wk_ref[...], x, preferred_element_type=jnp.float32) + bk_ref[...]  # (C8, N)
    v = jnp.dot(wv_ref[...], x, preferred_element_type=jnp.float32) + bv_ref[...]  # (C, N)

    # scores[n, m] = sum_c8 q[c8, n] * k[c8, m]  (contract the shared C8 axis directly).
    scores = lax.dot_general(q, k, (((0,), (0,)), ((), ())),
                             preferred_element_type=jnp.float32)            # (N, N)

    # softmax over the last (key) dim; reciprocal routed to the EUP slot.
    scores = scores - jnp.max(scores, axis=-1, keepdims=True)
    e = jnp.exp(scores)
    p = e * pl.reciprocal(jnp.sum(e, axis=-1, keepdims=True), approx=True)  # (N, N)

    # out[c, n] = sum_m v[c, m] * p[n, m]  -> lane-dense (C, N) output block.
    out = lax.dot_general(v.astype(jnp.bfloat16), p.astype(jnp.bfloat16),
                          (((1,), (1,)), ((), ())),
                          preferred_element_type=jnp.float32)               # (C, N)

    o_ref[0] = g_ref[0, 0] * out


def self_attention(x, wq, bq, wk, bk, wv, bv, gamma):
    """x: (B, C, H, W) float32.  wq/wk: (C//8, C, 1, 1), wv: (C, C, 1, 1) torch conv layout."""
    B, C, H, W = x.shape
    N = H * W
    C8 = wq.shape[0]

    x = x.astype(jnp.float32)
    # Free flat reshape of NCHW (no transpose pass); bf16 halves kernel input DMA.
    x_cn = x.reshape(B, C, N).astype(jnp.bfloat16)

    wq_m = wq.reshape(C8, C).astype(jnp.bfloat16)
    wk_m = wk.reshape(C8, C).astype(jnp.bfloat16)
    wv_m = wv.reshape(C, C).astype(jnp.bfloat16)
    bq_c = bq.reshape(C8, 1).astype(jnp.float32)
    bk_c = bk.reshape(C8, 1).astype(jnp.float32)
    bv_c = bv.reshape(C, 1).astype(jnp.float32)
    g_s = jnp.asarray(gamma, jnp.float32).reshape(1, 1)

    out_cn = pl.pallas_call(
        _self_attention_kernel,
        out_shape=jax.ShapeDtypeStruct((B, C, N), jnp.float32),
        grid=(B,),
        in_specs=[
            pl.BlockSpec((1, C, N), lambda b: (b, 0, 0)),      # x (channel-major, lane-dense)
            pl.BlockSpec((C8, C), lambda b: (0, 0)),           # Wq
            pl.BlockSpec((C8, C), lambda b: (0, 0)),           # Wk
            pl.BlockSpec((C, C), lambda b: (0, 0)),            # Wv
            pl.BlockSpec((C8, 1), lambda b: (0, 0)),           # bq
            pl.BlockSpec((C8, 1), lambda b: (0, 0)),           # bk
            pl.BlockSpec((C, 1), lambda b: (0, 0)),            # bv
            pl.BlockSpec(memory_space=pltpu.SMEM),             # gamma scalar
        ],
        out_specs=pl.BlockSpec((1, C, N), lambda b: (b, 0, 0)),
        compiler_params=pltpu.CompilerParams(dimension_semantics=("parallel",)),
    )(x_cn, wq_m, wk_m, wv_m, bq_c, bk_c, bv_c, g_s)

    # PyTorch quirk: the (B, N, C) bmm output is .view()-ed straight to (B, C, H, W)
    # (flat reinterpret, no transpose) before `gamma * out + x`.  out_cn is the true
    # transpose of that (B, N, C) buffer, so one small transpose + free flat reshape
    # reproduces the reinterpret exactly; gamma was already applied in-kernel.
    out_nc = jnp.transpose(out_cn, (0, 2, 1))                  # (B, N, C)
    return out_nc.reshape(B, C, H, W) + x


def _reference(x, wq, bq, wk, bk, wv, bv, gamma):
    """Pure-JAX f32 reference mirroring the PyTorch forward exactly."""
    B, C, H, W = x.shape
    N = H * W
    C8 = wq.shape[0]
    x_t = jnp.transpose(x, (0, 2, 3, 1)).reshape(B, N, C)
    q = x_t @ wq.reshape(C8, C).T + bq[None, None, :]
    k = x_t @ wk.reshape(C8, C).T + bk[None, None, :]
    v = x_t @ wv.reshape(C, C).T + bv[None, None, :]
    scores = jax.nn.softmax(jnp.einsum("bnc,bmc->bnm", q, k), axis=-1)
    out = jnp.einsum("bnm,bmc->bnc", scores, v)                # (B, N, C)
    out = out.reshape(B, C, H, W)                              # torch .view quirk
    return gamma * out + x


if __name__ == "__main__":
    B, C, H, W = 2, 16, 16, 16        # in_channels=16 -> C//8 = 2
    C8 = C // 8

    key = jax.random.PRNGKey(0)
    kx, kq, kk, kv, kbq, kbk, kbv = jax.random.split(key, 7)

    x = jax.random.normal(kx, (B, C, H, W), dtype=jnp.float32)
    wq = jax.random.normal(kq, (C8, C, 1, 1), dtype=jnp.float32) * 0.1
    wk = jax.random.normal(kk, (C8, C, 1, 1), dtype=jnp.float32) * 0.1
    wv = jax.random.normal(kv, (C, C, 1, 1), dtype=jnp.float32) * 0.1
    bq = jax.random.normal(kbq, (C8,), dtype=jnp.float32) * 0.1
    bk = jax.random.normal(kbk, (C8,), dtype=jnp.float32) * 0.1
    bv = jax.random.normal(kbv, (C,), dtype=jnp.float32) * 0.1
    # Module init sets gamma = 0; use a deterministic nonzero value so the attention path is exercised.
    gamma = jnp.float32(0.5)

    out = self_attention(x, wq, bq, wk, bk, wv, bv, gamma)
    jax.block_until_ready(out)

    ref = _reference(x, wq, bq, wk, bk, wv, bv, gamma)
    # bf16 MXU operands (f32 accumulation) -> loosened tolerance vs. the pure-f32 reference.
    np.testing.assert_allclose(np.asarray(out), np.asarray(ref), rtol=2e-2, atol=5e-3)

    print("KERNEL_OK")
</pallas_src>

<mosaic_0001>
module attributes {stable_mosaic.version = 11 : i64} {
  func.func @_self_attention_kernel(%arg0: i32, %arg1: memref<1x16x256xbf16, #tpu.memory_space<vmem>>, %arg2: memref<2x16xbf16, #tpu.memory_space<vmem>>, %arg3: memref<2x16xbf16, #tpu.memory_space<vmem>>, %arg4: memref<16x16xbf16, #tpu.memory_space<vmem>>, %arg5: memref<2x1xf32, #tpu.memory_space<vmem>>, %arg6: memref<2x1xf32, #tpu.memory_space<vmem>>, %arg7: memref<16x1xf32, #tpu.memory_space<vmem>>, %arg8: memref<1x1xf32, #tpu.memory_space<smem>>, %arg9: memref<1x16x256xf32, #tpu.memory_space<vmem>>) attributes {dimension_semantics = [#tpu.dimension_semantics<parallel>], iteration_bounds = array<i64: 2>, scalar_prefetch = 0 : i64, scratch_operands = 0 : i64, tpu.core_type = #tpu.core_type<tc>, window_params = [{transform_indices = @transform_0, window_bounds = array<i64: 1, 16, 256>}, {pipeline_mode = #tpu.pipeline_mode<synchronous>, transform_indices = @transform_1, window_bounds = array<i64: 2, 16>}, {pipeline_mode = #tpu.pipeline_mode<synchronous>, transform_indices = @transform_2, window_bounds = array<i64: 2, 16>}, {pipeline_mode = #tpu.pipeline_mode<synchronous>, transform_indices = @transform_3, window_bounds = array<i64: 16, 16>}, {pipeline_mode = #tpu.pipeline_mode<synchronous>, transform_indices = @transform_4, window_bounds = array<i64: 2, 1>}, {pipeline_mode = #tpu.pipeline_mode<synchronous>, transform_indices = @transform_5, window_bounds = array<i64: 2, 1>}, {pipeline_mode = #tpu.pipeline_mode<synchronous>, transform_indices = @transform_6, window_bounds = array<i64: 16, 1>}, {transform_indices = @transform_7, window_bounds = array<i64: 1, 1>}, {transform_indices = @transform_8, window_bounds = array<i64: 1, 16, 256>}]} {
    %c0 = arith.constant 0 : index
    %c0_0 = arith.constant 0 : index
    %c0_1 = arith.constant 0 : index
    %0 = vector.load %arg1[%c0, %c0_0, %c0_1] : memref<1x16x256xbf16, #tpu.memory_space<vmem>>, vector<1x16x256xbf16>
    %1 = vector.shape_cast %0 : vector<1x16x256xbf16> to vector<16x256xbf16>
    %c0_2 = arith.constant 0 : index
    %c0_3 = arith.constant 0 : index
    %2 = vector.load %arg2[%c0_2, %c0_3] : memref<2x16xbf16, #tpu.memory_space<vmem>>, vector<2x16xbf16>
    %cst = arith.constant dense<0.000000e+00> : vector<2x256xf32>
    %3 = tpu.matmul %2, %1, %cst {dimension_numbers = #tpu.dot_dimension_numbers<[1], [0], [0], [1], [0, 0, 1, 1], [], []>} : vector<2x16xbf16>, vector<16x256xbf16>, vector<2x256xf32> -> vector<2x256xf32>
    %c0_4 = arith.constant 0 : index
    %c0_5 = arith.constant 0 : index
    %4 = vector.load %arg5[%c0_4, %c0_5] : memref<2x1xf32, #tpu.memory_space<vmem>>, vector<2x1xf32>
    %5 = vector.broadcast %4 : vector<2x1xf32> to vector<2x256xf32>
    %6 = arith.addf %3, %5 : vector<2x256xf32>
    %c0_6 = arith.constant 0 : index
    %c0_7 = arith.constant 0 : index
    %7 = vector.load %arg3[%c0_6, %c0_7] : memref<2x16xbf16, #tpu.memory_space<vmem>>, vector<2x16xbf16>
    %cst_8 = arith.constant dense<0.000000e+00> : vector<2x256xf32>
    %8 = tpu.matmul %7, %1, %cst_8 {dimension_numbers = #tpu.dot_dimension_numbers<[1], [0], [0], [1], [0, 0, 1, 1], [], []>} : vector<2x16xbf16>, vector<16x256xbf16>, vector<2x256xf32> -> vector<2x256xf32>
    %c0_9 = arith.constant 0 : index
    %c0_10 = arith.constant 0 : index
    %9 = vector.load %arg6[%c0_9, %c0_10] : memref<2x1xf32, #tpu.memory_space<vmem>>, vector<2x1xf32>
    %10 = vector.broadcast %9 : vector<2x1xf32> to vector<2x256xf32>
    %11 = arith.addf %8, %10 : vector<2x256xf32>
    %c0_11 = arith.constant 0 : index
    %c0_12 = arith.constant 0 : index
    %12 = vector.load %arg4[%c0_11, %c0_12] : memref<16x16xbf16, #tpu.memory_space<vmem>>, vector<16x16xbf16>
    %cst_13 = arith.constant dense<0.000000e+00> : vector<16x256xf32>
    %13 = tpu.matmul %12, %1, %cst_13 {dimension_numbers = #tpu.dot_dimension_numbers<[1], [0], [0], [1], [0, 0, 1, 1], [], []>} : vector<16x16xbf16>, vector<16x256xbf16>, vector<16x256xf32> -> vector<16x256xf32>
    %c0_14 = arith.constant 0 : index
    %c0_15 = arith.constant 0 : index
    %14 = vector.load %arg7[%c0_14, %c0_15] : memref<16x1xf32, #tpu.memory_space<vmem>>, vector<16x1xf32>
    %15 = vector.broadcast %14 : vector<16x1xf32> to vector<16x256xf32>
    %16 = arith.addf %13, %15 : vector<16x256xf32>
    %cst_16 = arith.constant dense<0.000000e+00> : vector<256x256xf32>
    %17 = tpu.matmul %6, %11, %cst_16 {dimension_numbers = #tpu.dot_dimension_numbers<[0], [0], [1], [1], [0, 1, 1, 1], [], []>} : vector<2x256xf32>, vector<2x256xf32>, vector<256x256xf32> -> vector<256x256xf32>
    %cst_17 = arith.constant dense<0xFF800000> : vector<256xf32>
    %18 = vector.multi_reduction <maximumf>, %17, %cst_17 [1] : vector<256x256xf32> to vector<256xf32>
    %19 = vector.shape_cast %18 : vector<256xf32> to vector<256x1xf32>
    %20 = vector.broadcast %19 : vector<256x1xf32> to vector<256x256xf32>
    %21 = arith.subf %17, %20 : vector<256x256xf32>
    %22 = math.exp %21 : vector<256x256xf32>
    %cst_18 = arith.constant dense<0.000000e+00> : vector<256xf32>
    %23 = vector.multi_reduction <add>, %22, %cst_18 [1] : vector<256x256xf32> to vector<256xf32>
    %24 = vector.shape_cast %23 : vector<256xf32> to vector<256x1xf32>
    %25 = tpu.reciprocal %24 {approx = true} : vector<256x1xf32> -> vector<256x1xf32>
    %26 = vector.broadcast %25 : vector<256x1xf32> to vector<256x256xf32>
    %27 = arith.mulf %22, %26 : vector<256x256xf32>
    %28 = arith.truncf %16 : vector<16x256xf32> to vector<16x256xbf16>
    %29 = arith.truncf %27 : vector<256x256xf32> to vector<256x256xbf16>
    %cst_19 = arith.constant dense<0.000000e+00> : vector<16x256xf32>
    %30 = tpu.matmul %28, %29, %cst_19 {dimension_numbers = #tpu.dot_dimension_numbers<[1], [1], [0], [0], [0, 0, 1, 0], [], []>} : vector<16x256xbf16>, vector<256x256xbf16>, vector<16x256xf32> -> vector<16x256xf32>
    %c0_20 = arith.constant 0 : index
    %c0_21 = arith.constant 0 : index
    %31 = memref.load %arg8[%c0_20, %c0_21] : memref<1x1xf32, #tpu.memory_space<smem>>
    %32 = vector.broadcast %31 : f32 to vector<16x256xf32>
    %33 = arith.mulf %32, %30 : vector<16x256xf32>
    %c0_22 = arith.constant 0 : index
    %c0_23 = arith.constant 0 : index
    %c0_24 = arith.constant 0 : index
    %34 = vector.load %arg9[%c0_22, %c0_23, %c0_24] : memref<1x16x256xf32, #tpu.memory_space<vmem>>, vector<1x16x256xf32>
    %35 = vector.shape_cast %34 : vector<1x16x256xf32> to vector<16x256xf32>
    %36 = vector.shape_cast %33 : vector<16x256xf32> to vector<1x16x256xf32>
    tpu.vector_store %arg9[%c0_22, %c0_23, %c0_24], %36 {strides = array<i32>} : memref<1x16x256xf32, #tpu.memory_space<vmem>>, vector<1x16x256xf32>,
    return
  }
  func.func @transform_0(%arg0: i32) -> (i32, i32, i32) {
    %c0_i32 = arith.constant 0 : i32
    %c0_i32_0 = arith.constant 0 : i32
    %c0_i32_1 = arith.constant 0 : i32
    return %arg0, %c0_i32, %c0_i32_0 : i32, i32, i32
  }
  func.func @transform_1(%arg0: i32) -> (i32, i32) {
    %c0_i32 = arith.constant 0 : i32
    %c0_i32_0 = arith.constant 0 : i32
    %c0_i32_1 = arith.constant 0 : i32
    return %c0_i32, %c0_i32_0 : i32, i32
  }
  func.func @transform_2(%arg0: i32) -> (i32, i32) {
    %c0_i32 = arith.constant 0 : i32
    %c0_i32_0 = arith.constant 0 : i32
    %c0_i32_1 = arith.constant 0 : i32
    return %c0_i32, %c0_i32_0 : i32, i32
  }
  func.func @transform_3(%arg0: i32) -> (i32, i32) {
    %c0_i32 = arith.constant 0 : i32
    %c0_i32_0 = arith.constant 0 : i32
    %c0_i32_1 = arith.constant 0 : i32
    return %c0_i32, %c0_i32_0 : i32, i32
  }
  func.func @transform_4(%arg0: i32) -> (i32, i32) {
    %c0_i32 = arith.constant 0 : i32
    %c0_i32_0 = arith.constant 0 : i32
    %c0_i32_1 = arith.constant 0 : i32
    return %c0_i32, %c0_i32_0 : i32, i32
  }
  func.func @transform_5(%arg0: i32) -> (i32, i32) {
    %c0_i32 = arith.constant 0 : i32
    %c0_i32_0 = arith.constant 0 : i32
    %c0_i32_1 = arith.constant 0 : i32
    return %c0_i32, %c0_i32_0 : i32, i32
  }
  func.func @transform_6(%arg0: i32) -> (i32, i32) {
    %c0_i32 = arith.constant 0 : i32
    %c0_i32_0 = arith.constant 0 : i32
    %c0_i32_1 = arith.constant 0 : i32
    return %c0_i32, %c0_i32_0 : i32, i32
  }
  func.func @transform_7(%arg0: i32) -> (i32, i32) {
    %c0_i32 = arith.constant 0 : i32
    %c0_i32_0 = arith.constant 0 : i32
    %c0_i32_1 = arith.constant 0 : i32
    return %c0_i32, %c0_i32_0 : i32, i32
  }
  func.func @transform_8(%arg0: i32) -> (i32, i32, i32) {
    %c0_i32 = arith.constant 0 : i32
    %c0_i32_0 = arith.constant 0 : i32
    %c0_i32_1 = arith.constant 0 : i32
    return %arg0, %c0_i32, %c0_i32_0 : i32, i32, i32
  }
}

</mosaic_0001>

<bundles_post_ra>
// kernel: tpu_custom_call.1
= control target key start
LH: loop header
LB: loop body
LE: loop exit
PB: predicated region body
PF: predicated region fallthrough
CT: control target
= control target key end

     0   :  { %s2829_s0 = inlined_call_operand.hbm [shape: bf16[2,16,256], index: 0, kind: input, shape index: {}]   ;;  %s2830_s1 = inlined_call_operand.vmem [shape: bf16[2,16], index: 1, kind: input, shape index: {}]   ;;  %s2831_s2 = inlined_call_operand.vmem [shape: bf16[2,16], index: 2, kind: input, shape index: {}]   ;;  %s2832_s3 = inlined_call_operand.vmem [shape: bf16[16,16], index: 3, kind: input, shape index: {}]   ;;  %s2833_s4 = inlined_call_operand.vmem [shape: f32[2,1], index: 4, kind: input, shape index: {}]   ;;  %s2834_s5 = inlined_call_operand.vmem [shape: f32[2,1], index: 5, kind: input, shape index: {}]   ;;  %s2835_s6 = inlined_call_operand.vmem [shape: f32[16,1], index: 6, kind: input, shape index: {}]   ;;  %s2836_s7 = inlined_call_operand.<no memory space> [shape: f32[1,1], index: 7, kind: input, shape index: {}]   ;;  %s2837_s8 = inlined_call_operand.hbm [shape: f32[2,16,256], index: 8, kind: output, shape index: {}]  }
   0x1   :  { %13 = sst [smem:[#allocation2]] %s2836_s7 }
   0x2   :  { %14 = vsyncpa [#allocation4], 0 }
   0x3   :  { %16 = vsyncpa [#allocation4 + $0x1], 0 }
   0x4   :  { %17 = vsyncpa [#allocation5], 0 }
   0x5   :  { %19 = vsyncpa [#allocation5 + $0x1], 0  ;;  %s2045_s29 = smov 0   ;;  %s2047_s30 = smov 0  }
   0x6   :  { %s2049_s9 = smov 0   ;;  %s2051_s10 = smov 0  }
   0x7 LB: > { %s2066_s7 = sadd.s32 4294967295, %s1987_s10   ;;  %s1585_s11 = sadd.s32 4294967294, %s1987_s10   ;;  %s1987_s10 = sphi %s2051_s10, %s2934_s10   ;;  %s1983_s9 = sphi %s2049_s9, %s2933_s9   ;;  %s1979_s30 = sphi %s2047_s30, %s2932_s30   ;;  %s1975_s29 = sphi %s2045_s29, %s2931_s29  }
   0x8   : > { %s2070_s12 = sadd.s32 1, %s1987_s10   ;;  %s32_s13 = sadd.s32 1, %s1983_s9 }
   0x9   : > { %s29_s14 = ssub.s32 %s1987_s10, %s2070_s12  ;;  %p39_p0 = scmp.ne.s32.totalorder %s1983_s9, %s1979_s30 }
   0xa   : > { %p30_p1 = scmp.eq.s32.totalorder %s29_s14, 0  ;;  %p40_p2 = scmp.eq.s32.totalorder %s1987_s10, 0 }
   0xb   : > { %p45_p3 = scmp.ne.s32.totalorder %s1979_s30, %s1975_s29  ;;  %p46_p4 = scmp.eq.s32.totalorder %s2066_s7, 0 }
   0xc   : > { %s2082_s15 = scalar_select %p30_p1, %s1983_s9, %s32_s13  }
   0xd   : > { %p2084_p5 = por %p40_p2, %p39_p0  ;;  %p2088_p6 = por %p46_p4, %p45_p3 }
   0xe   : > { %p216_p7 = scmp.eq.s32.totalorder %s2066_s7, 1  ;;  %p222_p8 = scmp.eq.s32.totalorder %s1585_s11, 1 }
   0xf   : > { %p1653_p10 = scmp.lt.s32.totalorder %s1987_s10, 2  ;;  %s263_s20 = sand.u32 1, %s1983_s9  }
  0x10   : > { %p2095_p11 = por %p216_p7, %p39_p0  ;;  %p2099_p12 = por %p222_p8, %p45_p3 }
  0x11   : > { %s1639_s21 = sshll.u32 %s1987_s10, 8  ;;  %s1588_s22 = sshll.u32 %s263_s20, 4 }
  0x12   : > { %s2868_s18 = scalar_select %p2095_p11, 1, 0 }
  0x13   : > { %s2869_s19 = scalar_select %p2099_p12, 1, 0 }
  0x14   : > { %s2108_s25 = scalar_lea.hbm %s2829_s0, %s1639_s21  ;;  %s267_s26 = scalar_lea.vmem [#allocation3], %s1588_s22 }
  0x15   : > { %s274_s27 = sshll.u32 %s267_s26, 4  ;;  %p2112_p13 = pnand %p1653_p10, %p2084_p5  ;;  %s2116_s27 = int_to_ptr.vmem [resolvable:$true] %s274_s27 }
  0x16   : > { %s2118_s11 = scalar_lea.sflag [#allocation4], %s263_s20  ;;  %s1891_s13 = scalar_lea.hbm %s2108_s25, 256 }
  0x17   : > { %p1892_p0 = scmp.ne.s32.totalorder %s2108_s25, %s1891_s13  ;;  %p1893_p1 = pneg %p2112_p13 }
  0x18   : > { %s1896_s21 = scalar_lea.hbm %s2829_s0, 512  ;;  %p1897_p4 = scmp.lt.u32.totalorder %s2108_s25, %s2829_s0 }
  0x19   : > { %p1894_p2 = pnand %p1893_p1, %p1892_p0  ;;  %p1898_p5 = scmp.lt.u32.totalorder %s1896_s21, %s1891_s13 }
  0x1a   : > { %p1900_p8 = scmp.lt.u32.totalorder %s1891_s13, %s2108_s25 }
  0x1b   : > { %p1895_p3 = pneg %p1894_p2  ;;  %p1899_p7 = por %p1898_p5, %p1897_p4 }
  0x1d   : > { %p1901_p10 = por %p1900_p8, %p1899_p7 }
  0x1f   : > { %p1902_p9 = pnand %p1901_p10, %p1895_p3 }
  0x21   : > { %1905 = shalt.err (!%p1902_p9)
}
  0x22   : > { %s1906_s20 = scalar_lea.vmem %s2116_s27, 256  ;;  %s1989_s24 = smov [#allocation3]  }
  0x23   : > { %p1907_p0 = scmp.ne.s32.totalorder %s2116_s27, %s1906_s20  ;;  %s1911_s26 = sshll.u32 %s1989_s24, 4  ;;  %s1912_s26 = int_to_ptr.vmem [resolvable:$false] %s1911_s26 }
  0x24   : > { %s1913_s14 = scalar_lea.vmem %s1912_s26, 512  ;;  %p1914_p11 = scmp.lt.s32.totalorder %s2116_s27, %s1912_s26 }
  0x25   : > { %p1909_p2 = pnand %p1907_p0, %p1893_p1  ;;  %p1915_p4 = scmp.lt.s32.totalorder %s1913_s14, %s1906_s20 }
  0x27   : > { %p1910_p12 = pneg %p1909_p2  ;;  %p1916_p5 = por %p1915_p4, %p1914_p11 }
  0x29   : > { %p1917_p7 = pnand %p1916_p5, %p1910_p12 }
  0x2b   : > { %1920 = shalt.err (!%p1917_p7)
}
  0x2c   : > { %s1990_s13 = smov 128   ;;  %s1991_s16 = smov 8  }
  0x2d   : > { %1648 = dma.hbm_to_vmem [thread:$0]  (!%p2112_p13), %s2108_s25, 256, %s2116_s27, %s2118_s11, %s1990_s13, %s1990_s13, %s1991_s16  }
  0x2e   : > { %p1591_p9 = scmp.ge.s32.totalorder %s1987_s10, 1  ;;  %p282_p1 = scmp.lt.s32.totalorder %s1987_s10, 3 }
  0x30   : > { %p283_p3 = pnand %p1591_p9, %p282_p1 }
  0x32   : > { %286 = sbr.rel (%p283_p3) target bundleno = 1374 (0x55e), region = 52 }
  0x39   : > { %s2149_s21 = sand.u32 1, %s1979_s30  }
  0x3a   : > { %s1592_s22 = sshll.u32 %s2149_s21, 4  ;;  %s289_s23 = scalar_lea.sflag [#allocation4], %s2149_s21 }
  0x3b   : > { %s292_s20 = scalar_lea.vmem [#allocation3], %s1592_s22 }
  0x3c   : > { %1966 = dma.done.wait (%p2088_p6), %s289_s23, 256  }
  0x3d   : > { %1968 = vsyncadd (%p2088_p6), %s289_s23, 4294967040  ;;  %v1992_v0 = vmov 0   ;;  %v1695_v1 = vld [vmem:[%s292_s20 + $0x4] ss:$8 sps:$4 sm:$0xff]   ;;  %v1697_v2 = vld [vmem:[%s292_s20] ss:$8 sps:$4 sm:$0xff]  }
  0x3e   : > { %381 = vmatprep.mubr.bf16.mxu0 %v1992_v0  ;;  %432 = vmatprep.mubr.bf16.mxu1 %v1992_v0  ;;  %vm345_vm0 = vcmask 130048   ;;  %v329_v3 = vld [vmem:[%s2833_s4] sm:$0x3]  ;;  %v1993_v7 = vmov 0.0   ;;  %vm667_vm1 = vcmask 1041408   ;;  %vm570_vm2 = vcmask 15360  }
  0x3f   : > { %1693 = vset.pattern.permute.xlu0 %v1992_v0  ;;  %349 = vmatprep.subr.bf16.mxu0 %v1695_v1  ;;  %v328_v4 = vld [vmem:[%s2830_s1] sm:$0x1]  ;;  %s1488_s27 = sld [smem:[#allocation2]]  ;;  %s1593_s28 = sshll.u32 %s2149_s21, 5 }
  0x40   : > { %400 = vmatprep.subr.bf16.mxu1 %v1695_v1  ;;  %350 = vmatpush1.bf16.msra.mxu0 %v1697_v2  ;;  %v390_v5 = vld [vmem:[%s2831_s2] sm:$0x1]  ;;  %s324_s11 = scalar_lea.vmem [#allocation6], %s1593_s28  ;;  %s1640_s24 = sshll.u32 %s2066_s7, 9 }
  0x41   : > { %401 = vmatpush1.bf16.msra.mxu1 %v1697_v2  ;;  %332 = vperm.xlu0 %1693, %v329_v3   ;;  %v391_v6 = vld [vmem:[%s2834_s5] sm:$0x3]  ;;  %s1512_s17 = sshll.u32 %s324_s11, 4  ;;  %s2785_s13 = scalar_lea.hbm %s2837_s8, %s1640_s24  ;;  %s2780_s17 = int_to_ptr.vmem [resolvable:$true] %s1512_s17 }
  0x42   : > { %463 = vmatprep.subr.bf16.mxu0 %v1695_v1  ;;  %s1499_s7 = scalar_lea.sflag [#allocation5], %s2149_s21  ;;  %s1921_s16 = scalar_lea.vmem %s2780_s17, 512 }
  0x43   : > { %1596 = vmatmul.mubr.msk.bf16.vlgmr.msra.gmra.mrb[0].mxu0 %vm345_vm0, %v328_v4  ;;  %p1922_p6 = scmp.ne.s32.totalorder %s2780_s17, %s1921_s16  ;;  %p2928_p11 = scmp.ne.s32.totalorder %s2868_s18, 0 }
  0x44   : > { %1597 = vmatmul.mubr.msk.bf16.vlgmr.msra.gmra.mrb[0].mxu1 %vm345_vm0, %v390_v5  ;;  %464 = vmatpush1.bf16.msra.mxu0 %v1697_v2  ;;  %s1994_s22 = smov [#allocation6]  }
  0x45   : > { %495 = vmatprep.mubr.bf16.mxu0 %v1992_v0  ;;  %394 = vperm.xlu0 %1693, %v391_v6   ;;  %p1923_p12 = pnand %p1922_p6, %p2928_p11  ;;  %s1925_s23 = sshll.u32 %s1994_s22, 4  ;;  %s1926_s23 = int_to_ptr.vmem [resolvable:$false] %s1925_s23 }
  0x46   : > { %738 = vmatprep.mubr.f32.mxu1 %v1993_v7  ;;  %s1927_s20 = scalar_lea.vmem %s1926_s23, 1024  ;;  %p1928_p8 = scmp.lt.s32.totalorder %s2780_s17, %s1926_s23 }
  0x47   : > { %p1924_p13 = pneg %p1923_p12  ;;  %p1929_p10 = scmp.lt.s32.totalorder %s1927_s20, %s1921_s16 }
  0x49   : > { %p1930_p0 = por %p1929_p10, %p1928_p8 }
  0x4b   : > { %p1931_p2 = pnand %p1930_p0, %p1924_p13 }
  0xc0   : > { %v333_v8 = vpop.permute.xlu0 %332 }
  0xc4   : > { %v395_v9 = vpop.permute.xlu0 %394 }
 0x116   : > { %v383_v10 = vpop.f32.mrb[0].mxu0 }
 0x117   : > { %v434_v11 = vpop.f32.mrb[0].mxu1  ;;  %v385_v12 = vpop.f32.mrb[1].mxu0  ;;  %v384_v14 = vadd.f32 %v383_v10, %v333_v8 }
 0x118   : > { %v436_v13 = vpop.f32.mrb[1].mxu1  ;;  %v387_v16 = vpop.f32.mrb[2].mxu0  ;;  %v435_v18 = vadd.f32 %v434_v11, %v395_v9  ;;  %v386_v21 = vadd.f32 %v385_v12, %v333_v8 }
 0x119   : > { %v437_v15 = vadd.f32 %v436_v13, %v395_v9  ;;  %v438_v17 = vpop.f32.mrb[2].mxu1  ;;  %v388_v19 = vpop.f32.mrb[3].mxu0  ;;  %506 = vxpose.xlu1.b32.start.end [1/1] (short) %v384_v14, 128 }
 0x11a   : > { %v439_v20 = vpop.f32.mrb[3].mxu1 }
 0x11b   : > { %1600 = vmatprep.subr.msk.mxu1 %vm667_vm1, %v437_v15 }
 0x11c   : > { %1601 = vmatpush1.msk.msra.mxu1 %vm667_vm1, %v435_v18 }
 0x156   : > { %538 = vxpose.xlu1.b32.start.end [1/1] (short) %v386_v21, 128 }
 0x174   : > { %1694 = vset.pattern.permute.xlu1 %v1992_v0 }
 0x199   : > { %v522_v22 = vpop.trf.xlu1 }
 0x19a   : > { %1602 = vmatmul.mubr.msk.f32.vlgmr.msra.gmra.mrb[4].mxu1 %vm570_vm2, %v522_v22 }
 0x19b   : > { %744 = vmatprep.mubr.f32.mxu1 %v1993_v7 }
 0x19d   : > { %v523_v23 = vpop.trf.xlu1 }
 0x19e   : > { %1603 = vmatmul.mubr.msk.f32.gmra.mrb[6].mxu1 %vm570_vm2, %v523_v23 }
 0x19f   : > { %750 = vmatprep.mubr.f32.mxu1 %v1993_v7 }
 0x1a1   : > { %v524_v24 = vpop.trf.xlu1 }
 0x1a2   : > { %1604 = vmatmul.mubr.msk.f32.gmra.mrb[8].mxu1 %vm570_vm2, %v524_v24 }
 0x1a3   : > { %756 = vmatprep.mubr.f32.mxu1 %v1993_v7 }
 0x1a5   : > { %v525_v25 = vpop.trf.xlu1 }
 0x1a6   : > { %1605 = vmatmul.mubr.msk.f32.gmra.mrb[10].mxu1 %vm570_vm2, %v525_v25 }
 0x1a7   : > { %762 = vmatprep.mubr.f32.mxu1 %v1993_v7 }
 0x1a9   : > { %v526_v26 = vpop.trf.xlu1 }
 0x1aa   : > { %1606 = vmatmul.mubr.msk.f32.gmra.mrb[12].mxu1 %vm570_vm2, %v526_v26 }
 0x1ab   : > { %768 = vmatprep.mubr.f32.mxu1 %v1993_v7 }
 0x1ad   : > { %v527_v27 = vpop.trf.xlu1 }
 0x1ae   : > { %1607 = vmatmul.mubr.msk.f32.gmra.mrb[14].mxu1 %vm570_vm2, %v527_v27 }
 0x1af   : > { %774 = vmatprep.mubr.f32.mxu1 %v1993_v7 }
 0x1b1   : > { %v528_v28 = vpop.trf.xlu1 }
 0x1b2   : > { %1608 = vmatmul.mubr.msk.f32.gmra.mrb[16].mxu1 %vm570_vm2, %v528_v28 }
 0x1b3   : > { %780 = vmatprep.mubr.f32.mxu1 %v1993_v7 }
 0x1b5   : > { %v529_v29 = vpop.trf.xlu1 }
 0x1b6   : > { %1609 = vmatmul.mubr.msk.f32.gmra.mrb[18].mxu1 %vm570_vm2, %v529_v29 }
 0x1b7   : > { %786 = vmatprep.mubr.f32.mxu1 %v1993_v7 }
 0x1b9   : > { %v530_v30 = vpop.trf.xlu1 }
 0x1ba   : > { %1610 = vmatmul.mubr.msk.f32.gmra.mrb[20].mxu1 %vm570_vm2, %v530_v30 }
 0x1bb   : > { %792 = vmatprep.mubr.f32.mxu1 %v1993_v7 }
 0x1bd   : > { %v531_v31 = vpop.trf.xlu1 }
 0x1be   : > { %1611 = vmatmul.mubr.msk.f32.gmra.mrb[22].mxu1 %vm570_vm2, %v531_v31 }
 0x1bf   : > { %798 = vmatprep.mubr.f32.mxu1 %v1993_v7 }
 0x1c1   : > { %v532_v32 = vpop.trf.xlu1 }
 0x1c2   : > { %1612 = vmatmul.mubr.msk.f32.gmra.mrb[24].mxu1 %vm570_vm2, %v532_v32 }
 0x1c3   : > { %804 = vmatprep.mubr.f32.mxu1 %v1993_v7 }
 0x1c5   : > { %v533_v33 = vpop.trf.xlu1 }
 0x1c6   : > { %1613 = vmatmul.mubr.msk.f32.gmra.mrb[26].mxu1 %vm570_vm2, %v533_v33 }
 0x1c7   : > { %810 = vmatprep.mubr.f32.mxu1 %v1993_v7 }
 0x1c9   : > { %v534_v34 = vpop.trf.xlu1 }
 0x1ca   : > { %1614 = vmatmul.mubr.msk.f32.gmra.mrb[28].mxu1 %vm570_vm2, %v534_v34 }
 0x1cb   : > { %816 = vmatprep.mubr.f32.mxu1 %v1993_v7 }
 0x1cd   : > { %v535_v35 = vpop.trf.xlu1 }
 0x1ce   : > { %1615 = vmatmul.mubr.msk.f32.gmra.mrb[30].mxu1 %vm570_vm2, %v535_v35 }
 0x1cf   : > { %822 = vmatprep.mubr.f32.mxu1 %v1993_v7 }
 0x1d1   : > { %v536_v36 = vpop.trf.xlu1 }
 0x1d2   : > { %1616 = vmatmul.mubr.msk.f32.gmra.mrb[32].mxu1 %vm570_vm2, %v536_v36 }
 0x1d3   : > { %828 = vmatprep.mubr.f32.mxu1 %v1993_v7 }
 0x1d5   : > { %v537_v37 = vpop.trf.xlu1 }
 0x1d6   : > { %1617 = vmatmul.mubr.msk.f32.gmra.mrb[34].mxu1 %vm570_vm2, %v537_v37 }
 0x1d7   : > { %834 = vmatprep.mubr.f32.mxu1 %v1993_v7 }
 0x1d9   : > { %v554_v38 = vpop.trf.xlu1 }
 0x1da   : > { %1618 = vmatmul.mubr.msk.f32.gmra.mrb[36].mxu1 %vm570_vm2, %v554_v38 }
 0x1db   : > { %840 = vmatprep.mubr.f32.mxu1 %v1993_v7 }
 0x1dd   : > { %v555_v39 = vpop.trf.xlu1 }
 0x1de   : > { %1619 = vmatmul.mubr.msk.f32.gmra.mrb[38].mxu1 %vm570_vm2, %v555_v39 }
 0x1df   : > { %846 = vmatprep.mubr.f32.mxu1 %v1993_v7 }
 0x1e1   : > { %v556_v40 = vpop.trf.xlu1 }
 0x1e2   : > { %1620 = vmatmul.mubr.msk.f32.gmra.mrb[40].mxu1 %vm570_vm2, %v556_v40 }
 0x1e3   : > { %852 = vmatprep.mubr.f32.mxu1 %v1993_v7 }
 0x1e5   : > { %v557_v41 = vpop.trf.xlu1 }
 0x1e6   : > { %1621 = vmatmul.mubr.msk.f32.gmra.mrb[42].mxu1 %vm570_vm2, %v557_v41 }
 0x1e7   : > { %858 = vmatprep.mubr.f32.mxu1 %v1993_v7 }
 0x1e9   : > { %v558_v42 = vpop.trf.xlu1 }
 0x1ea   : > { %1622 = vmatmul.mubr.msk.f32.gmra.mrb[44].mxu1 %vm570_vm2, %v558_v42 }
 0x1eb   : > { %864 = vmatprep.mubr.f32.mxu1 %v1993_v7 }
 0x1ed   : > { %v559_v43 = vpop.trf.xlu1 }
 0x1ee   : > { %1623 = vmatmul.mubr.msk.f32.gmra.mrb[46].mxu1 %vm570_vm2, %v559_v43 }
 0x1ef   : > { %870 = vmatprep.mubr.f32.mxu1 %v1993_v7 }
 0x1f1   : > { %v560_v44 = vpop.trf.xlu1 }
 0x1f2   : > { %1624 = vmatmul.mubr.msk.f32.gmra.mrb[48].mxu1 %vm570_vm2, %v560_v44 }
 0x1f3   : > { %876 = vmatprep.mubr.f32.mxu1 %v1993_v7 }
 0x1f5   : > { %v561_v45 = vpop.trf.xlu1 }
 0x1f6   : > { %1625 = vmatmul.mubr.msk.f32.gmra.mrb[50].mxu1 %vm570_vm2, %v561_v45 }
 0x1f7   : > { %882 = vmatprep.mubr.f32.mxu1 %v1993_v7 }
 0x1f9   : > { %v562_v46 = vpop.trf.xlu1 }
 0x1fa   : > { %1626 = vmatmul.mubr.msk.f32.gmra.mrb[52].mxu1 %vm570_vm2, %v562_v46 }
 0x1fb   : > { %888 = vmatprep.mubr.f32.mxu1 %v1993_v7 }
 0x1fd   : > { %v563_v47 = vpop.trf.xlu1 }
 0x1fe   : > { %1627 = vmatmul.mubr.msk.f32.gmra.mrb[54].mxu1 %vm570_vm2, %v563_v47 }
 0x1ff   : > { %894 = vmatprep.mubr.f32.mxu1 %v1993_v7 }
 0x201   : > { %v564_v48 = vpop.trf.xlu1 }
 0x202   : > { %1628 = vmatmul.mubr.msk.f32.gmra.mrb[56].mxu1 %vm570_vm2, %v564_v48 }
 0x203   : > { %900 = vmatprep.mubr.f32.mxu1 %v1993_v7 }
 0x205   : > { %v565_v49 = vpop.trf.xlu1 }
 0x206   : > { %1629 = vmatmul.mubr.msk.f32.gmra.mrb[58].mxu1 %vm570_vm2, %v565_v49 }
 0x207   : > { %906 = vmatprep.mubr.f32.mxu1 %v1993_v7 }
 0x209   : > { %v566_v50 = vpop.trf.xlu1 }
 0x20a   : > { %1630 = vmatmul.mubr.msk.f32.gmra.mrb[60].mxu1 %vm570_vm2, %v566_v50 }
 0x20b   : > { %912 = vmatprep.mubr.f32.mxu1 %v1993_v7 }
 0x20d   : > { %v567_v51 = vpop.trf.xlu1 }
 0x20e   : > { %1631 = vmatmul.mubr.msk.f32.gmra.mrb[62].mxu1 %vm570_vm2, %v567_v51 }
 0x20f   : > { %918 = vmatprep.mubr.f32.mxu1 %v1993_v7 }
 0x211   : > { %v568_v52 = vpop.trf.xlu1 }
 0x212   : > { %1632 = vmatmul.mubr.msk.f32.gmra.mrb[64].mxu1 %vm570_vm2, %v568_v52 }
 0x213   : > { %924 = vmatprep.mubr.f32.mxu1 %v1993_v7 }
 0x215   : > { %v569_v53 = vpop.trf.xlu1 }
 0x216   : > { %1633 = vmatmul.mubr.msk.f32.gmra.mrb[66].mxu1 %vm570_vm2, %v569_v53 }
 0x26d   : > { %v2235_v54 = vpop.f32.mrb[4].mxu1 }
 0x26e   : > { %v2237_v55 = vpop.f32.mrb[5].mxu1 }
 0x26f   : > { %v931_v56 = vmax.f32 %v2235_v54, %v2237_v55 }
 0x271   : > { %932 = vmax.xlane.f32.xlu0 %v931_v56  ;;  %v2241_v57 = vpop.f32.mrb[6].mxu1 }
 0x272   : > { %v2243_v58 = vpop.f32.mrb[7].mxu1 }
 0x273   : > { %v934_v59 = vmax.f32 %v2241_v57, %v2243_v58 }
 0x275   : > { %935 = vmax.xlane.f32.xlu0 %v934_v59  ;;  %v2247_v60 = vpop.f32.mrb[8].mxu1 }
 0x276   : > { %v2249_v61 = vpop.f32.mrb[9].mxu1 }
 0x277   : > { %v937_v62 = vmax.f32 %v2247_v60, %v2249_v61 }
 0x279   : > { %938 = vmax.xlane.f32.xlu0 %v937_v62  ;;  %v2253_v63 = vpop.f32.mrb[10].mxu1 }
 0x27a   : > { %v2255_v0 = vpop.f32.mrb[11].mxu1 }
 0x27b   : > { %v940_v1 = vmax.f32 %v2253_v63, %v2255_v0 }
 0x27d   : > { %941 = vmax.xlane.f32.xlu0 %v940_v1  ;;  %v2259_v2 = vpop.f32.mrb[12].mxu1 }
 0x27e   : > { %v2261_v3 = vpop.f32.mrb[13].mxu1 }
 0x27f   : > { %v943_v4 = vmax.f32 %v2259_v2, %v2261_v3 }
 0x281   : > { %944 = vmax.xlane.f32.xlu0 %v943_v4  ;;  %v2265_v5 = vpop.f32.mrb[14].mxu1 }
 0x282   : > { %v2267_v6 = vpop.f32.mrb[15].mxu1 }
 0x283   : > { %v946_v7 = vmax.f32 %v2265_v5, %v2267_v6 }
 0x285   : > { %947 = vmax.xlane.f32.xlu0 %v946_v7  ;;  %v2271_v8 = vpop.f32.mrb[16].mxu1 }
 0x286   : > { %v2273_v9 = vpop.f32.mrb[17].mxu1 }
 0x287   : > { %v949_v10 = vmax.f32 %v2271_v8, %v2273_v9 }
 0x289   : > { %950 = vmax.xlane.f32.xlu0 %v949_v10  ;;  %v2277_v11 = vpop.f32.mrb[18].mxu1 }
 0x28a   : > { %v2279_v12 = vpop.f32.mrb[19].mxu1 }
 0x28b   : > { %v952_v13 = vmax.f32 %v2277_v11, %v2279_v12 }
 0x28d   : > { %953 = vmax.xlane.f32.xlu0 %v952_v13  ;;  %v2283_v14 = vpop.f32.mrb[20].mxu1 }
 0x28e   : > { %v2285_v15 = vpop.f32.mrb[21].mxu1 }
 0x28f   : > { %v955_v16 = vmax.f32 %v2283_v14, %v2285_v15 }
 0x291   : > { %956 = vmax.xlane.f32.xlu1 %v955_v16  ;;  %v2289_v17 = vpop.f32.mrb[22].mxu1 }
 0x292   : > { %v2291_v18 = vpop.f32.mrb[23].mxu1 }
 0x293   : > { %v958_v19 = vmax.f32 %v2289_v17, %v2291_v18 }
 0x295   : > { %959 = vmax.xlane.f32.xlu0 %v958_v19  ;;  %v2295_v20 = vpop.f32.mrb[24].mxu1 }
 0x296   : > { %v2297_v21 = vpop.f32.mrb[25].mxu1 }
 0x297   : > { %v961_v22 = vmax.f32 %v2295_v20, %v2297_v21 }
 0x299   : > { %962 = vmax.xlane.f32.xlu0 %v961_v22  ;;  %v2301_v23 = vpop.f32.mrb[26].mxu1 }
 0x29a   : > { %v2303_v24 = vpop.f32.mrb[27].mxu1 }
 0x29b   : > { %v964_v25 = vmax.f32 %v2301_v23, %v2303_v24 }
 0x29d   : > { %965 = vmax.xlane.f32.xlu0 %v964_v25  ;;  %v2307_v26 = vpop.f32.mrb[28].mxu1 }
 0x29e   : > { %v2309_v27 = vpop.f32.mrb[29].mxu1 }
 0x29f   : > { %v967_v28 = vmax.f32 %v2307_v26, %v2309_v27 }
 0x2a1   : > { %968 = vmax.xlane.f32.xlu0 %v967_v28  ;;  %v2313_v29 = vpop.f32.mrb[30].mxu1 }
 0x2a2   : > { %v2315_v30 = vpop.f32.mrb[31].mxu1 }
 0x2a3   : > { %v970_v31 = vmax.f32 %v2313_v29, %v2315_v30 }
 0x2a5   : > { %971 = vmax.xlane.f32.xlu0 %v970_v31  ;;  %v2319_v32 = vpop.f32.mrb[32].mxu1 }
 0x2a6   : > { %v2321_v33 = vpop.f32.mrb[33].mxu1 }
 0x2a7   : > { %v973_v34 = vmax.f32 %v2319_v32, %v2321_v33 }
 0x2a9   : > { %974 = vmax.xlane.f32.xlu0 %v973_v34  ;;  %v2325_v35 = vpop.f32.mrb[34].mxu1 }
 0x2aa   : > { %v2327_v36 = vpop.f32.mrb[35].mxu1 }
 0x2ab   : > { %v976_v37 = vmax.f32 %v2325_v35, %v2327_v36 }
 0x2ad   : > { %977 = vmax.xlane.f32.xlu0 %v976_v37  ;;  %v2331_v38 = vpop.f32.mrb[36].mxu1 }
 0x2ae   : > { %v2333_v39 = vpop.f32.mrb[37].mxu1 }
 0x2af   : > { %v979_v40 = vmax.f32 %v2331_v38, %v2333_v39 }
 0x2b1   : > { %980 = vmax.xlane.f32.xlu0 %v979_v40  ;;  %v2337_v41 = vpop.f32.mrb[38].mxu1 }
 0x2b2   : > { %v2339_v42 = vpop.f32.mrb[39].mxu1 }
 0x2b3   : > { %v982_v43 = vmax.f32 %v2337_v41, %v2339_v42 }
 0x2b5   : > { %983 = vmax.xlane.f32.xlu0 %v982_v43  ;;  %v2343_v44 = vpop.f32.mrb[40].mxu1 }
 0x2b6   : > { %v2345_v45 = vpop.f32.mrb[41].mxu1 }
 0x2b7   : > { %v985_v46 = vmax.f32 %v2343_v44, %v2345_v45 }
 0x2b9   : > { %986 = vmax.xlane.f32.xlu0 %v985_v46  ;;  %v2349_v47 = vpop.f32.mrb[42].mxu1 }
 0x2ba   : > { %v2351_v48 = vpop.f32.mrb[43].mxu1 }
 0x2bb   : > { %v988_v49 = vmax.f32 %v2349_v47, %v2351_v48 }
 0x2bd   : > { %989 = vmax.xlane.f32.xlu0 %v988_v49  ;;  %v2355_v50 = vpop.f32.mrb[44].mxu1 }
 0x2be   : > { %v2357_v51 = vpop.f32.mrb[45].mxu1 }
 0x2bf   : > { %v991_v52 = vmax.f32 %v2355_v50, %v2357_v51 }
 0x2c1   : > { %992 = vmax.xlane.f32.xlu0 %v991_v52  ;;  %v2361_v53 = vpop.f32.mrb[46].mxu1 }
 0x2c2   : > { %v2363_v56 = vpop.f32.mrb[47].mxu1 }
 0x2c3   : > { %v994_v59 = vmax.f32 %v2361_v53, %v2363_v56 }
 0x2c5   : > { %995 = vmax.xlane.f32.xlu0 %v994_v59  ;;  %v2367_v62 = vpop.f32.mrb[48].mxu1 }
 0x2c6   : > { %v2369_v1 = vpop.f32.mrb[49].mxu1 }
 0x2c7   : > { %v997_v4 = vmax.f32 %v2367_v62, %v2369_v1 }
 0x2c9   : > { %998 = vmax.xlane.f32.xlu0 %v997_v4  ;;  %v2373_v7 = vpop.f32.mrb[50].mxu1 }
 0x2ca   : > { %2871 = vst [vmem:[#allocation9_spill] sm:$0xff] %v2373_v7  ;;  %v2375_v10 = vpop.f32.mrb[51].mxu1 }
 0x2cb   : > { %2872 = vst [vmem:[#allocation10_spill] sm:$0xff] %v2375_v10  ;;  %v1000_v13 = vmax.f32 %v2373_v7, %v2375_v10 }
 0x2cd   : > { %1001 = vmax.xlane.f32.xlu0 %v1000_v13  ;;  %v2379_v16 = vpop.f32.mrb[52].mxu1 }
 0x2ce   : > { %2873 = vst [vmem:[#allocation11_spill] sm:$0xff] %v2379_v16  ;;  %v2381_v19 = vpop.f32.mrb[53].mxu1 }
 0x2cf   : > { %2874 = vst [vmem:[#allocation12_spill] sm:$0xff] %v2381_v19  ;;  %v1003_v22 = vmax.f32 %v2379_v16, %v2381_v19 }
 0x2d1   : > { %1004 = vmax.xlane.f32.xlu0 %v1003_v22  ;;  %v2385_v25 = vpop.f32.mrb[54].mxu1 }
 0x2d2   : > { %2875 = vst [vmem:[#allocation13_spill] sm:$0xff] %v2385_v25  ;;  %v2387_v28 = vpop.f32.mrb[55].mxu1 }
 0x2d3   : > { %2876 = vst [vmem:[#allocation14_spill] sm:$0xff] %v2387_v28  ;;  %v1006_v31 = vmax.f32 %v2385_v25, %v2387_v28  ;;  %v1698_v25 = vld [vmem:[%s2832_s3] sm:$0xff]  }
 0x2d4   : > { %1599 = vmatmul.mubr.msk.bf16.vlgmr.msra.gmra.mrb[4].mxu0 %vm345_vm0, %v1698_v25 }
 0x2d5   : > { %1007 = vmax.xlane.f32.xlu0 %v1006_v31  ;;  %v2391_v34 = vpop.f32.mrb[56].mxu1 }
 0x2d6   : > { %2877 = vst [vmem:[#allocation15_spill] sm:$0xff] %v2391_v34  ;;  %v2393_v37 = vpop.f32.mrb[57].mxu1 }
 0x2d7   : > { %2878 = vst [vmem:[#allocation16_spill] sm:$0xff] %v2393_v37  ;;  %v1009_v40 = vmax.f32 %v2391_v34, %v2393_v37 }
 0x2d9   : > { %1010 = vmax.xlane.f32.xlu0 %v1009_v40  ;;  %v2397_v43 = vpop.f32.mrb[58].mxu1 }
 0x2da   : > { %2879 = vst [vmem:[#allocation17_spill] sm:$0xff] %v2397_v43  ;;  %v2399_v46 = vpop.f32.mrb[59].mxu1 }
 0x2db   : > { %2880 = vst [vmem:[#allocation18_spill] sm:$0xff] %v2399_v46  ;;  %v1012_v49 = vmax.f32 %v2397_v43, %v2399_v46 }
 0x2dd   : > { %1013 = vmax.xlane.f32.xlu0 %v1012_v49  ;;  %v2403_v52 = vpop.f32.mrb[60].mxu1 }
 0x2de   : > { %2881 = vst [vmem:[#allocation19_spill] sm:$0xff] %v2403_v52  ;;  %v2405_v59 = vpop.f32.mrb[61].mxu1 }
 0x2df   : > { %2882 = vst [vmem:[#allocation20_spill] sm:$0xff] %v2405_v59  ;;  %v1015_v4 = vmax.f32 %v2403_v52, %v2405_v59 }
 0x2e1   : > { %1016 = vmax.xlane.f32.xlu1 %v1015_v4  ;;  %v2409_v13 = vpop.f32.mrb[62].mxu1 }
 0x2e2   : > { %v2411_v22 = vpop.f32.mrb[63].mxu1 }
 0x2e5   : > { %v2415_v40 = vpop.f32.mrb[64].mxu1 }
 0x2e6   : > { %v2417_v37 = vpop.f32.mrb[65].mxu1 }
 0x2e9   : > { %v2421_v46 = vpop.f32.mrb[66].mxu1 }
 0x2ea   : > { %v2423_v43 = vpop.f32.mrb[67].mxu1 }
 0x2fe   : > { %v933_v59 = vpop.xlane.xlu0 %932 }
 0x2ff   : > { %v1027_v52 = vsub.f32 %v2235_v54, %v933_v59  ;;  %v1028_v34 = vsub.f32 %v2237_v55, %v933_v59 }
 0x301   : > { %v1091_v31 = vmul.f32 1.442695, %v1027_v52  ;;  %v1093_v28 = vmul.f32 1.442695, %v1028_v34 }
 0x302   : > { %v936_v19 = vpop.xlane.xlu0 %935 }
 0x303   : > { %1699 = vpow2.f32 %v1091_v31  ;;  %v1029_v49 = vsub.f32 %v2241_v57, %v936_v19  ;;  %v1030_v16 = vsub.f32 %v2243_v58, %v936_v19 }
 0x304   : > { %1701 = vpow2.f32 %v1093_v28 }
 0x305   : > { %v1095_v4 = vmul.f32 1.442695, %v1029_v49  ;;  %v1097_v10 = vmul.f32 1.442695, %v1030_v16 }
 0x306   : > { %v939_v54 = vpop.xlane.xlu0 %938 }
 0x307   : > { %1703 = vpow2.f32 %v1095_v4  ;;  %v1031_v55 = vsub.f32 %v2247_v60, %v939_v54  ;;  %v1032_v34 = vsub.f32 %v2249_v61, %v939_v54 }
 0x308   : > { %1705 = vpow2.f32 %v1097_v10 }
 0x309   : > { %v1099_v52 = vmul.f32 1.442695, %v1031_v55  ;;  %v1101_v59 = vmul.f32 1.442695, %v1032_v34 }
 0x30a   : > { %v942_v7 = vpop.xlane.xlu0 %941 }
 0x30b   : > { %1707 = vpow2.f32 %v1099_v52  ;;  %v1033_v57 = vsub.f32 %v2253_v63, %v942_v7  ;;  %v1034_v58 = vsub.f32 %v2255_v0, %v942_v7 }
 0x30c   : > { %1709 = vpow2.f32 %v1101_v59 }
 0x30d   : > { %v2439_v19 = vpop.eup %1699  ;;  %v1103_v25 = vmul.f32 1.442695, %v1033_v57  ;;  %v1105_v16 = vmul.f32 1.442695, %v1034_v58 }
 0x30e   : > { %v2441_v28 = vpop.eup %1701  ;;  %v945_v31 = vpop.xlane.xlu0 %944 }
 0x30f   : > { %1711 = vpow2.f32 %v1103_v25  ;;  %v1035_v60 = vsub.f32 %v2259_v2, %v945_v31  ;;  %v1036_v61 = vsub.f32 %v2261_v3, %v945_v31  ;;  %v1219_v10 = vadd.f32 %v2441_v28, %v2439_v19 }
 0x310   : > { %1713 = vpow2.f32 %v1105_v16 }
 0x311   : > { %v2447_v63 = vpop.eup %1703  ;;  %v1107_v0 = vmul.f32 1.442695, %v1035_v60  ;;  %v1109_v7 = vmul.f32 1.442695, %v1036_v61  ;;  %1220 = vadd.xlane.f32.xlu0 %v1219_v10 }
 0x312   : > { %v2449_v49 = vpop.eup %1705  ;;  %v948_v4 = vpop.xlane.xlu0 %947 }
 0x313   : > { %1715 = vpow2.f32 %v1107_v0  ;;  %v1037_v54 = vsub.f32 %v2265_v5, %v948_v4  ;;  %v1038_v55 = vsub.f32 %v2267_v6, %v948_v4  ;;  %v1222_v2 = vadd.f32 %v2449_v49, %v2447_v63 }
 0x314   : > { %1717 = vpow2.f32 %v1109_v7 }
 0x315   : > { %v2455_v3 = vpop.eup %1707  ;;  %v1111_v34 = vmul.f32 1.442695, %v1037_v54  ;;  %v1113_v52 = vmul.f32 1.442695, %v1038_v55  ;;  %1223 = vadd.xlane.f32.xlu0 %v1222_v2 }
 0x316   : > { %v2457_v59 = vpop.eup %1709  ;;  %v951_v57 = vpop.xlane.xlu0 %950 }
 0x317   : > { %1719 = vpow2.f32 %v1111_v34  ;;  %v1039_v58 = vsub.f32 %v2271_v8, %v951_v57  ;;  %v1040_v25 = vsub.f32 %v2273_v9, %v951_v57  ;;  %v1225_v5 = vadd.f32 %v2457_v59, %v2455_v3 }
 0x318   : > { %1721 = vpow2.f32 %v1113_v52 }
 0x319   : > { %v2463_v6 = vpop.eup %1711  ;;  %v1115_v16 = vmul.f32 1.442695, %v1039_v58  ;;  %v1117_v31 = vmul.f32 1.442695, %v1040_v25  ;;  %1226 = vadd.xlane.f32.xlu0 %v1225_v5 }
 0x31a   : > { %v2465_v60 = vpop.eup %1713  ;;  %v954_v61 = vpop.xlane.xlu0 %953 }
 0x31b   : > { %1723 = vpow2.f32 %v1115_v16  ;;  %v1041_v10 = vsub.f32 %v2277_v11, %v954_v61  ;;  %v1042_v0 = vsub.f32 %v2279_v12, %v954_v61  ;;  %v1228_v8 = vadd.f32 %v2465_v60, %v2463_v6 }
 0x31c   : > { %1725 = vpow2.f32 %v1117_v31 }
 0x31d   : > { %v2471_v9 = vpop.eup %1715  ;;  %v1119_v7 = vmul.f32 1.442695, %v1041_v10  ;;  %v1121_v4 = vmul.f32 1.442695, %v1042_v0  ;;  %1229 = vadd.xlane.f32.xlu0 %v1228_v8 }
 0x31e   : > { %v2473_v54 = vpop.eup %1717  ;;  %v957_v55 = vpop.xlane.xlu1 %956 }
 0x31f   : > { %1727 = vpow2.f32 %v1119_v7  ;;  %v1043_v2 = vsub.f32 %v2283_v14, %v957_v55  ;;  %v1044_v34 = vsub.f32 %v2285_v15, %v957_v55  ;;  %v1231_v11 = vadd.f32 %v2473_v54, %v2471_v9 }
 0x320   : > { %1729 = vpow2.f32 %v1121_v4 }
 0x321   : > { %v2479_v12 = vpop.eup %1719  ;;  %v1123_v52 = vmul.f32 1.442695, %v1043_v2  ;;  %v1125_v57 = vmul.f32 1.442695, %v1044_v34  ;;  %1232 = vadd.xlane.f32.xlu0 %v1231_v11  ;;  %v2883_v2 = vmax.f32 %v2409_v13, %v2411_v22 }
 0x322   : > { %v2481_v58 = vpop.eup %1721  ;;  %v960_v25 = vpop.xlane.xlu0 %959 }
 0x323   : > { %1731 = vpow2.f32 %v1123_v52  ;;  %v1045_v5 = vsub.f32 %v2289_v17, %v960_v25  ;;  %v1046_v16 = vsub.f32 %v2291_v18, %v960_v25  ;;  %v1234_v14 = vadd.f32 %v2481_v58, %v2479_v12 }
 0x324   : > { %1733 = vpow2.f32 %v1125_v57 }
 0x325   : > { %v2487_v15 = vpop.eup %1723  ;;  %v1127_v31 = vmul.f32 1.442695, %v1045_v5  ;;  %v1129_v61 = vmul.f32 1.442695, %v1046_v16  ;;  %1235 = vadd.xlane.f32.xlu0 %v1234_v14  ;;  %v2884_v16 = vmax.f32 %v2415_v40, %v2417_v37 }
 0x326   : > { %v2489_v10 = vpop.eup %1725  ;;  %v963_v0 = vpop.xlane.xlu0 %962 }
 0x327   : > { %1735 = vpow2.f32 %v1127_v31  ;;  %v1047_v8 = vsub.f32 %v2295_v20, %v963_v0  ;;  %v1048_v7 = vsub.f32 %v2297_v21, %v963_v0  ;;  %v1237_v17 = vadd.f32 %v2489_v10, %v2487_v15 }
 0x328   : > { %1737 = vpow2.f32 %v1129_v61 }
 0x329   : > { %v2495_v18 = vpop.eup %1727  ;;  %v1131_v4 = vmul.f32 1.442695, %v1047_v8  ;;  %v1133_v55 = vmul.f32 1.442695, %v1048_v7  ;;  %1238 = vadd.xlane.f32.xlu1 %v1237_v17  ;;  %1019 = vmax.xlane.f32.xlu0 %v2883_v2  ;;  %v2885_v17 = vmax.f32 %v2421_v46, %v2423_v43 }
 0x32a   : > { %v2500_v34 = vpop.eup %1729  ;;  %v966_v11 = vpop.xlane.xlu0 %965 }
 0x32b   : > { %1739 = vpow2.f32 %v1131_v4  ;;  %v1049_v20 = vsub.f32 %v2301_v23, %v966_v11  ;;  %v1050_v21 = vsub.f32 %v2303_v24, %v966_v11  ;;  %v1240_v52 = vadd.f32 %v2500_v34, %v2495_v18 }
 0x32c   : > { %1741 = vpow2.f32 %v1133_v55 }
 0x32d   : > { %v2506_v57 = vpop.eup %1731  ;;  %v1135_v25 = vmul.f32 1.442695, %v1049_v20  ;;  %v1137_v5 = vmul.f32 1.442695, %v1050_v21  ;;  %1241 = vadd.xlane.f32.xlu0 %v1240_v52  ;;  %1022 = vmax.xlane.f32.xlu1 %v2884_v16 }
 0x32e   : > { %v2511_v14 = vpop.eup %1733  ;;  %v969_v31 = vpop.xlane.xlu0 %968 }
 0x32f   : > { %1743 = vpow2.f32 %v1135_v25  ;;  %v1051_v23 = vsub.f32 %v2307_v26, %v969_v31  ;;  %v1052_v24 = vsub.f32 %v2309_v27, %v969_v31  ;;  %v1243_v61 = vadd.f32 %v2511_v14, %v2506_v57 }
 0x330   : > { %1745 = vpow2.f32 %v1137_v5 }
 0x331   : > { %v2517_v0 = vpop.eup %1735  ;;  %v1139_v8 = vmul.f32 1.442695, %v1051_v23  ;;  %v1141_v7 = vmul.f32 1.442695, %v1052_v24  ;;  %1025 = vmax.xlane.f32.xlu0 %v2885_v17  ;;  %1244 = vadd.xlane.f32.xlu1 %v1243_v61 }
 0x332   : > { %v2522_v4 = vpop.eup %1737  ;;  %v972_v55 = vpop.xlane.xlu0 %971 }
 0x333   : > { %1747 = vpow2.f32 %v1139_v8  ;;  %v1053_v26 = vsub.f32 %v2313_v29, %v972_v55  ;;  %v1054_v27 = vsub.f32 %v2315_v30, %v972_v55  ;;  %v1246_v2 = vadd.f32 %v2522_v4, %v2517_v0 }
 0x334   : > { %1749 = vpow2.f32 %v1141_v7 }
 0x335   : > { %v2528_v11 = vpop.eup %1739  ;;  %v1143_v20 = vmul.f32 1.442695, %v1053_v26  ;;  %v1145_v21 = vmul.f32 1.442695, %v1054_v27  ;;  %1247 = vadd.xlane.f32.xlu0 %v1246_v2 }
 0x336   : > { %v2530_v52 = vpop.eup %1741  ;;  %v975_v25 = vpop.xlane.xlu0 %974 }
 0x337   : > { %1751 = vpow2.f32 %v1143_v20  ;;  %v1055_v5 = vsub.f32 %v2319_v32, %v975_v25  ;;  %v1056_v16 = vsub.f32 %v2321_v33, %v975_v25  ;;  %v1249_v29 = vadd.f32 %v2530_v52, %v2528_v11 }
 0x338   : > { %1753 = vpow2.f32 %v1145_v21 }
 0x339   : > { %v2536_v30 = vpop.eup %1743  ;;  %v1147_v31 = vmul.f32 1.442695, %v1055_v5  ;;  %v1149_v23 = vmul.f32 1.442695, %v1056_v16  ;;  %1250 = vadd.xlane.f32.xlu1 %v1249_v29 }
 0x33a   : > { %v2538_v24 = vpop.eup %1745  ;;  %v978_v61 = vpop.xlane.xlu0 %977 }
 0x33b   : > { %1755 = vpow2.f32 %v1147_v31  ;;  %v1057_v8 = vsub.f32 %v2325_v35, %v978_v61  ;;  %v1058_v7 = vsub.f32 %v2327_v36, %v978_v61  ;;  %v1252_v32 = vadd.f32 %v2538_v24, %v2536_v30 }
 0x33c   : > { %1757 = vpow2.f32 %v1149_v23 }
 0x33d   : > { %v2544_v33 = vpop.eup %1747  ;;  %v1151_v17 = vmul.f32 1.442695, %v1057_v8  ;;  %v1153_v55 = vmul.f32 1.442695, %v1058_v7  ;;  %1253 = vadd.xlane.f32.xlu0 %v1252_v32 }
 0x33e   : > { %v2546_v26 = vpop.eup %1749  ;;  %v981_v27 = vpop.xlane.xlu0 %980 }
 0x33f   : > { %1759 = vpow2.f32 %v1151_v17  ;;  %v1059_v2 = vsub.f32 %v2331_v38, %v981_v27  ;;  %v1060_v20 = vsub.f32 %v2333_v39, %v981_v27  ;;  %v1255_v35 = vadd.f32 %v2546_v26, %v2544_v33 }
 0x340   : > { %1761 = vpow2.f32 %v1153_v55 }
 0x341   : > { %v2552_v36 = vpop.eup %1751  ;;  %v1155_v21 = vmul.f32 1.442695, %v1059_v2  ;;  %v1157_v25 = vmul.f32 1.442695, %v1060_v20  ;;  %1256 = vadd.xlane.f32.xlu1 %v1255_v35 }
 0x342   : > { %v2554_v5 = vpop.eup %1753  ;;  %v984_v16 = vpop.xlane.xlu0 %983 }
 0x343   : > { %1763 = vpow2.f32 %v1155_v21  ;;  %v1061_v29 = vsub.f32 %v2337_v41, %v984_v16  ;;  %v1062_v31 = vsub.f32 %v2339_v42, %v984_v16  ;;  %v1258_v38 = vadd.f32 %v2554_v5, %v2552_v36 }
 0x344   : > { %1765 = vpow2.f32 %v1157_v25 }
 0x345   : > { %v2560_v39 = vpop.eup %1755  ;;  %v1159_v23 = vmul.f32 1.442695, %v1061_v29  ;;  %v1161_v61 = vmul.f32 1.442695, %v1062_v31  ;;  %1259 = vadd.xlane.f32.xlu0 %v1258_v38 }
 0x346   : > { %v2562_v8 = vpop.eup %1757  ;;  %v987_v7 = vpop.xlane.xlu0 %986 }
 0x347   : > { %1767 = vpow2.f32 %v1159_v23  ;;  %v1063_v32 = vsub.f32 %v2343_v44, %v987_v7  ;;  %v1064_v17 = vsub.f32 %v2345_v45, %v987_v7  ;;  %v1261_v41 = vadd.f32 %v2562_v8, %v2560_v39 }
 0x348   : > { %1769 = vpow2.f32 %v1161_v61 }
 0x349   : > { %v2568_v42 = vpop.eup %1759  ;;  %v1163_v55 = vmul.f32 1.442695, %v1063_v32  ;;  %v1165_v27 = vmul.f32 1.442695, %v1064_v17  ;;  %1262 = vadd.xlane.f32.xlu1 %v1261_v41 }
 0x34a   : > { %v2570_v2 = vpop.eup %1761  ;;  %v990_v20 = vpop.xlane.xlu0 %989 }
 0x34b   : > { %1771 = vpow2.f32 %v1163_v55  ;;  %v1065_v35 = vsub.f32 %v2349_v47, %v990_v20  ;;  %v1066_v21 = vsub.f32 %v2351_v48, %v990_v20  ;;  %v1264_v44 = vadd.f32 %v2570_v2, %v2568_v42 }
 0x34c   : > { %1773 = vpow2.f32 %v1165_v27 }
 0x34d   : > { %v2576_v45 = vpop.eup %1763  ;;  %v1167_v25 = vmul.f32 1.442695, %v1065_v35  ;;  %v1169_v16 = vmul.f32 1.442695, %v1066_v21  ;;  %1265 = vadd.xlane.f32.xlu0 %v1264_v44 }
 0x34e   : > { %v2578_v29 = vpop.eup %1765  ;;  %v993_v31 = vpop.xlane.xlu0 %992 }
 0x34f   : > { %1775 = vpow2.f32 %v1167_v25  ;;  %v1067_v38 = vsub.f32 %v2355_v50, %v993_v31  ;;  %v1068_v23 = vsub.f32 %v2357_v51, %v993_v31  ;;  %v1267_v47 = vadd.f32 %v2578_v29, %v2576_v45 }
 0x350   : > { %1777 = vpow2.f32 %v1169_v16 }
 0x351   : > { %v2584_v48 = vpop.eup %1767  ;;  %v1171_v61 = vmul.f32 1.442695, %v1067_v38  ;;  %v1173_v7 = vmul.f32 1.442695, %v1068_v23  ;;  %1268 = vadd.xlane.f32.xlu1 %v1267_v47  ;;  %v2886_v47 = vld [vmem:[#allocation9_spill] sm:$0xff] }
 0x352   : > { %v2586_v32 = vpop.eup %1769  ;;  %v996_v17 = vpop.xlane.xlu0 %995 }
 0x353   : > { %1779 = vpow2.f32 %v1171_v61  ;;  %v1069_v41 = vsub.f32 %v2361_v53, %v996_v17  ;;  %v1070_v55 = vsub.f32 %v2363_v56, %v996_v17  ;;  %v1270_v50 = vadd.f32 %v2586_v32, %v2584_v48 }
 0x354   : > { %1781 = vpow2.f32 %v1173_v7  ;;  %v2887_v7 = vld [vmem:[#allocation10_spill] sm:$0xff] }
 0x355   : > { %v2592_v51 = vpop.eup %1771  ;;  %v1175_v27 = vmul.f32 1.442695, %v1069_v41  ;;  %v1177_v20 = vmul.f32 1.442695, %v1070_v55  ;;  %1271 = vadd.xlane.f32.xlu0 %v1270_v50 }
 0x356   : > { %v2594_v35 = vpop.eup %1773  ;;  %v999_v21 = vpop.xlane.xlu0 %998 }
 0x357   : > { %1783 = vpow2.f32 %v1175_v27  ;;  %v1071_v44 = vsub.f32 %v2367_v62, %v999_v21  ;;  %v1072_v25 = vsub.f32 %v2369_v1, %v999_v21  ;;  %v1273_v53 = vadd.f32 %v2594_v35, %v2592_v51 }
 0x358   : > { %1785 = vpow2.f32 %v1177_v20  ;;  %v2890_v20 = vld [vmem:[#allocation11_spill] sm:$0xff] }
 0x359   : > { %v2600_v56 = vpop.eup %1775  ;;  %v1179_v16 = vmul.f32 1.442695, %v1071_v44  ;;  %v1181_v31 = vmul.f32 1.442695, %v1072_v25  ;;  %1274 = vadd.xlane.f32.xlu1 %v1273_v53  ;;  %v2891_v44 = vld [vmem:[#allocation12_spill] sm:$0xff] }
 0x35a   : > { %v2602_v38 = vpop.eup %1777  ;;  %v1002_v23 = vpop.xlane.xlu0 %1001 }
 0x35b   : > { %1787 = vpow2.f32 %v1179_v16  ;;  %v1073_v61 = vsub.f32 %v2886_v47, %v1002_v23  ;;  %v1074_v17 = vsub.f32 %v2887_v7, %v1002_v23  ;;  %v1276_v62 = vadd.f32 %v2602_v38, %v2600_v56  ;;  %v2894_v7 = vld [vmem:[#allocation13_spill] sm:$0xff] }
 0x35c   : > { %1789 = vpow2.f32 %v1181_v31 }
 0x35d   : > { %v2608_v1 = vpop.eup %1779  ;;  %v1183_v41 = vmul.f32 1.442695, %v1073_v61  ;;  %v1185_v55 = vmul.f32 1.442695, %v1074_v17  ;;  %1277 = vadd.xlane.f32.xlu0 %v1276_v62  ;;  %v2895_v62 = vld [vmem:[#allocation14_spill] sm:$0xff] }
 0x35e   : > { %2888 = vst [vmem:[#allocation9_spill] sm:$0xff] %v2608_v1  ;;  %v2610_v50 = vpop.eup %1781  ;;  %v1005_v27 = vpop.xlane.xlu0 %1004 }
 0x35f   : > { %2889 = vst [vmem:[#allocation10_spill] sm:$0xff] %v2610_v50  ;;  %1791 = vpow2.f32 %v1183_v41  ;;  %v1075_v21 = vsub.f32 %v2890_v20, %v1005_v27  ;;  %v1076_v25 = vsub.f32 %v2891_v44, %v1005_v27  ;;  %v1279_v53 = vadd.f32 %v2610_v50, %v2608_v1 }
 0x360   : > { %1793 = vpow2.f32 %v1185_v55 }
 0x361   : > { %v2616_v16 = vpop.eup %1783  ;;  %v1187_v31 = vmul.f32 1.442695, %v1075_v21  ;;  %v1189_v23 = vmul.f32 1.442695, %v1076_v25  ;;  %1280 = vadd.xlane.f32.xlu1 %v1279_v53  ;;  %v2898_v53 = vld [vmem:[#allocation15_spill] sm:$0xff] }
 0x362   : > { %2892 = vst [vmem:[#allocation11_spill] sm:$0xff] %v2616_v16  ;;  %v2618_v47 = vpop.eup %1785  ;;  %v1008_v61 = vpop.xlane.xlu0 %1007 }
 0x363   : > { %2893 = vst [vmem:[#allocation12_spill] sm:$0xff] %v2618_v47  ;;  %1795 = vpow2.f32 %v1187_v31  ;;  %v1077_v17 = vsub.f32 %v2894_v7, %v1008_v61  ;;  %v1078_v41 = vsub.f32 %v2895_v62, %v1008_v61  ;;  %v1282_v27 = vadd.f32 %v2618_v47, %v2616_v16  ;;  %v2899_v31 = vld [vmem:[#allocation16_spill] sm:$0xff] }
 0x364   : > { %1797 = vpow2.f32 %v1189_v23 }
 0x365   : > { %v2624_v20 = vpop.eup %1787  ;;  %v1191_v55 = vmul.f32 1.442695, %v1077_v17  ;;  %v1193_v44 = vmul.f32 1.442695, %v1078_v41  ;;  %1283 = vadd.xlane.f32.xlu0 %v1282_v27  ;;  %v2900_v27 = vld [vmem:[#allocation17_spill] sm:$0xff] }
 0x366   : > { %2896 = vst [vmem:[#allocation13_spill] sm:$0xff] %v2624_v20  ;;  %v2626_v21 = vpop.eup %1789  ;;  %v1011_v25 = vpop.xlane.xlu0 %1010 }
 0x367   : > { %2897 = vst [vmem:[#allocation14_spill] sm:$0xff] %v2626_v21  ;;  %1799 = vpow2.f32 %v1191_v55  ;;  %v1079_v1 = vsub.f32 %v2898_v53, %v1011_v25  ;;  %v1080_v50 = vsub.f32 %v2899_v31, %v1011_v25  ;;  %v1285_v61 = vadd.f32 %v2626_v21, %v2624_v20  ;;  %v2901_v55 = vld [vmem:[#allocation18_spill] sm:$0xff] }
 0x368   : > { %1801 = vpow2.f32 %v1193_v44 }
 0x369   : > { %v2632_v7 = vpop.eup %1791  ;;  %v1195_v23 = vmul.f32 1.442695, %v1079_v1  ;;  %v1197_v62 = vmul.f32 1.442695, %v1080_v50  ;;  %1286 = vadd.xlane.f32.xlu1 %v1285_v61  ;;  %v2903_v61 = vld [vmem:[#allocation19_spill] sm:$0xff] }
 0x36a   : > { %v2634_v17 = vpop.eup %1793  ;;  %v1014_v41 = vpop.xlane.xlu0 %1013 }
 0x36b   : > { %1803 = vpow2.f32 %v1195_v23  ;;  %v1081_v16 = vsub.f32 %v2900_v27, %v1014_v41  ;;  %v1082_v47 = vsub.f32 %v2901_v55, %v1014_v41  ;;  %v1288_v25 = vadd.f32 %v2634_v17, %v2632_v7  ;;  %v2904_v23 = vld [vmem:[#allocation20_spill] sm:$0xff] }
 0x36c   : > { %1805 = vpow2.f32 %v1197_v62 }
 0x36d   : > { %v2640_v53 = vpop.eup %1795  ;;  %v1199_v44 = vmul.f32 1.442695, %v1081_v16  ;;  %v1201_v31 = vmul.f32 1.442695, %v1082_v47  ;;  %1289 = vadd.xlane.f32.xlu0 %v1288_v25 }
 0x36e   : > { %2902 = vst [vmem:[#allocation15_spill] sm:$0xff] %v2640_v53  ;;  %v2642_v1 = vpop.eup %1797  ;;  %v1017_v50 = vpop.xlane.xlu1 %1016 }
 0x36f   : > { %1807 = vpow2.f32 %v1199_v44  ;;  %v1083_v20 = vsub.f32 %v2903_v61, %v1017_v50  ;;  %v1084_v21 = vsub.f32 %v2904_v23, %v1017_v50  ;;  %v1291_v41 = vadd.f32 %v2642_v1, %v2640_v53 }
 0x370   : > { %1809 = vpow2.f32 %v1201_v31 }
 0x371   : > { %v2648_v27 = vpop.eup %1799  ;;  %v1203_v62 = vmul.f32 1.442695, %v1083_v20  ;;  %v1205_v55 = vmul.f32 1.442695, %v1084_v21  ;;  %1292 = vadd.xlane.f32.xlu1 %v1291_v41 }
 0x372   : > { %2905 = vst [vmem:[#allocation16_spill] sm:$0xff] %v2648_v27  ;;  %v2650_v16 = vpop.eup %1801 }
 0x373   : > { %2906 = vst [vmem:[#allocation17_spill] sm:$0xff] %v2650_v16  ;;  %1811 = vpow2.f32 %v1203_v62  ;;  %v1294_v47 = vadd.f32 %v2650_v16, %v2648_v27 }
 0x374   : > { %1813 = vpow2.f32 %v1205_v55 }
 0x375   : > { %v2654_v25 = vpop.eup %1803  ;;  %1295 = vadd.xlane.f32.xlu0 %v1294_v47 }
 0x376   : > { %2907 = vst [vmem:[#allocation18_spill] sm:$0xff] %v2654_v25  ;;  %v2656_v44 = vpop.eup %1805 }
 0x377   : > { %2908 = vst [vmem:[#allocation19_spill] sm:$0xff] %v2656_v44  ;;  %v1297_v31 = vadd.f32 %v2656_v44, %v2654_v25 }
 0x379   : > { %v2660_v50 = vpop.eup %1807  ;;  %1298 = vadd.xlane.f32.xlu1 %v1297_v31 }
 0x37a   : > { %2909 = vst [vmem:[#allocation20_spill] sm:$0xff] %v2660_v50  ;;  %v2662_v20 = vpop.eup %1809 }
 0x37b   : > { %2910 = vst [vmem:[#allocation21_spill] sm:$0xff] %v2662_v20  ;;  %v1300_v21 = vadd.f32 %v2662_v20, %v2660_v50 }
 0x37d   : > { %v2666_v61 = vpop.eup %1811  ;;  %1301 = vadd.xlane.f32.xlu0 %v1300_v21 }
 0x37e   : > { %2911 = vst [vmem:[#allocation22_spill] sm:$0xff] %v2666_v61  ;;  %v2668_v23 = vpop.eup %1813 }
 0x37f   : > { %2912 = vst [vmem:[#allocation23_spill] sm:$0xff] %v2668_v23  ;;  %v1303_v41 = vadd.f32 %v2668_v23, %v2666_v61 }
 0x381   : > { %1304 = vadd.xlane.f32.xlu1 %v1303_v41 }
 0x39e   : > { %v1221_v62 = vpop.xlane.xlu0 %1220 }
 0x39f   : > { %1815 = vrcp.f32 %v1221_v62 }
 0x3a2   : > { %v1224_v55 = vpop.xlane.xlu0 %1223 }
 0x3a3   : > { %1817 = vrcp.f32 %v1224_v55 }
 0x3a6   : > { %v1227_v47 = vpop.xlane.xlu0 %1226 }
 0x3a7   : > { %1819 = vrcp.f32 %v1227_v47 }
 0x3a9   : > { %v1816_v25 = vpop.eup %1815 }
 0x3aa   : > { %v1230_v31 = vpop.xlane.xlu0 %1229  ;;  %v1348_v20 = vmul.f32 %v1816_v25, %v2441_v28  ;;  %v1347_v53 = vmul.f32 %v1816_v25, %v2439_v19 }
 0x3ab   : > { %1821 = vrcp.f32 %v1230_v31 }
 0x3ad   : > { %v1818_v44 = vpop.eup %1817 }
 0x3ae   : > { %v1233_v50 = vpop.xlane.xlu0 %1232  ;;  %v1350_v21 = vmul.f32 %v1818_v44, %v2449_v49  ;;  %v1349_v61 = vmul.f32 %v1818_v44, %v2447_v63 }
 0x3af   : > { %1823 = vrcp.f32 %v1233_v50 }
 0x3b0   : > { %v1414_v41 = vpack.c.bf16 %v1350_v21, %v1348_v20  ;;  %v1413_v23 = vpack.c.bf16 %v1349_v61, %v1347_v53 }
 0x3b1   : > { %v1820_v55 = vpop.eup %1819 }
 0x3b2   : > { %1445 = vmatprep.subr.bf16.mxu0 %v1414_v41  ;;  %v1236_v62 = vpop.xlane.xlu0 %1235  ;;  %v1352_v16 = vmul.f32 %v1820_v55, %v2457_v59  ;;  %v1351_v49 = vmul.f32 %v1820_v55, %v2455_v3 }
 0x3b3   : > { %1825 = vrcp.f32 %v1236_v62  ;;  %1446 = vmatpush1.bf16.xpose.msra.mxu0 %v1413_v23 }
 0x3b5   : > { %v1822_v47 = vpop.eup %1821 }
 0x3b6   : > { %v1020_v31 = vpop.xlane.xlu0 %1019  ;;  %v1239_v27 = vpop.xlane.xlu1 %1238  ;;  %v1354_v28 = vmul.f32 %v1822_v47, %v2465_v60  ;;  %v1353_v19 = vmul.f32 %v1822_v47, %v2463_v6 }
 0x3b7   : > { %v1085_v63 = vsub.f32 %v2409_v13, %v1020_v31  ;;  %v1086_v53 = vsub.f32 %v2411_v22, %v1020_v31  ;;  %1827 = vrcp.f32 %v1239_v27 }
 0x3b8   : > { %v1416_v25 = vpack.c.bf16 %v1354_v28, %v1352_v16  ;;  %v1415_v44 = vpack.c.bf16 %v1353_v19, %v1351_v49 }
 0x3b9   : > { %v1207_v50 = vmul.f32 1.442695, %v1085_v63  ;;  %v1209_v20 = vmul.f32 1.442695, %v1086_v53  ;;  %v1824_v21 = vpop.eup %1823 }
 0x3ba   : > { %1447 = vmatprep.subr.bf16.mxu0 %v1416_v25  ;;  %v1242_v61 = vpop.xlane.xlu0 %1241  ;;  %v1023_v23 = vpop.xlane.xlu1 %1022  ;;  %v1356_v16 = vmul.f32 %v1824_v21, %v2473_v54  ;;  %v1355_v41 = vmul.f32 %v1824_v21, %v2471_v9 }
 0x3bb   : > { %1829 = vpow2.f32 %v1207_v50  ;;  %v1087_v59 = vsub.f32 %v2415_v40, %v1023_v23  ;;  %v1088_v3 = vsub.f32 %v2417_v37, %v1023_v23  ;;  %1448 = vmatpush1.bf16.xpose.msra.mxu0 %v1415_v44 }
 0x3bc   : > { %1831 = vpow2.f32 %v1209_v20 }
 0x3bd   : > { %v1826_v6 = vpop.eup %1825  ;;  %1833 = vrcp.f32 %v1242_v61  ;;  %v1211_v13 = vmul.f32 1.442695, %v1087_v59  ;;  %v1213_v22 = vmul.f32 1.442695, %v1088_v3 }
 0x3be   : > { %v1026_v60 = vpop.xlane.xlu0 %1025  ;;  %v1358_v27 = vmul.f32 %v1826_v6, %v2481_v58  ;;  %v1357_v62 = vmul.f32 %v1826_v6, %v2479_v12  ;;  %v1245_v55 = vpop.xlane.xlu1 %1244 }
 0x3bf   : > { %1835 = vpow2.f32 %v1211_v13  ;;  %v1089_v40 = vsub.f32 %v2421_v46, %v1026_v60  ;;  %v1090_v37 = vsub.f32 %v2423_v43, %v1026_v60 }
 0x3c0   : > { %1837 = vpow2.f32 %v1213_v22  ;;  %v1418_v47 = vpack.c.bf16 %v1358_v27, %v1356_v16  ;;  %v1417_v31 = vpack.c.bf16 %v1357_v62, %v1355_v41 }
 0x3c1   : > { %v1215_v28 = vmul.f32 1.442695, %v1089_v40  ;;  %v1217_v49 = vmul.f32 1.442695, %v1090_v37  ;;  %1839 = vrcp.f32 %v1245_v55  ;;  %v1828_v58 = vpop.eup %1827 }
 0x3c2   : > { %1449 = vmatprep.subr.bf16.mxu0 %v1418_v47  ;;  %v1248_v54 = vpop.xlane.xlu0 %1247  ;;  %v1360_v63 = vmul.f32 %v1828_v58, %v2489_v10  ;;  %v1359_v25 = vmul.f32 %v1828_v58, %v2487_v15 }
 0x3c3   : > { %1841 = vpow2.f32 %v1215_v28  ;;  %1450 = vmatpush1.bf16.xpose.msra.mxu0 %v1417_v31 }
 0x3c4   : > { %1843 = vpow2.f32 %v1217_v49 }
 0x3c5   : > { %v2690_v9 = vpop.eup %1829  ;;  %1845 = vrcp.f32 %v1248_v54  ;;  %v443_v54 = vld [vmem:[%s2835_s6] sm:$0xff] }
 0x3c6   : > { %v2692_v12 = vpop.eup %1831  ;;  %v1251_v46 = vpop.xlane.xlu1 %1250 }
 0x3c7   : > { %v1834_v43 = vpop.eup %1833  ;;  %v1306_v19 = vadd.f32 %v2692_v12, %v2690_v9  ;;  %1847 = vrcp.f32 %v1251_v46 }
 0x3c8   : > { %v1362_v53 = vmul.f32 %v1834_v43, %v2500_v34  ;;  %v1361_v44 = vmul.f32 %v1834_v43, %v2495_v18  ;;  %v2727_v43 = vpop.f32.mrb[4].mxu0 }
 0x3c9   : > { %v2700_v50 = vpop.eup %1835  ;;  %1307 = vadd.xlane.f32.xlu0 %v1306_v19 }
 0x3ca   : > { %v2702_v20 = vpop.eup %1837  ;;  %v1254_v61 = vpop.xlane.xlu0 %1253  ;;  %v1420_v23 = vpack.c.bf16 %v1362_v53, %v1360_v63  ;;  %v1419_v21 = vpack.c.bf16 %v1361_v44, %v1359_v25 }
 0x3cb   : > { %1849 = vrcp.f32 %v1254_v61  ;;  %v1309_v59 = vadd.f32 %v2702_v20, %v2700_v50  ;;  %v1840_v10 = vpop.eup %1839  ;;  %v2729_v63 = vpop.f32.mrb[5].mxu0 }
 0x3cc   : > { %1451 = vmatprep.subr.bf16.mxu0 %v1420_v23  ;;  %v1364_v13 = vmul.f32 %v1840_v10, %v2511_v14  ;;  %v1363_v60 = vmul.f32 %v1840_v10, %v2506_v57  ;;  %v2731_v25 = vpop.f32.mrb[6].mxu0 }
 0x3cd   : > { %v2706_v34 = vpop.eup %1841  ;;  %1452 = vmatpush1.bf16.xpose.msra.mxu0 %v1419_v21  ;;  %1310 = vadd.xlane.f32.xlu1 %v1309_v59  ;;  %v2733_v61 = vpop.f32.mrb[7].mxu0 }
 0x3ce   : > { %v2708_v15 = vpop.eup %1843  ;;  %v1257_v18 = vpop.xlane.xlu1 %1256 }
 0x3cf   : > { %v1846_v3 = vpop.eup %1845  ;;  %v1312_v6 = vadd.f32 %v2708_v15, %v2706_v34  ;;  %1851 = vrcp.f32 %v1257_v18 }
 0x3d0   : > { %v1366_v22 = vmul.f32 %v1846_v3, %v2522_v4  ;;  %v1365_v16 = vmul.f32 %v1846_v3, %v2517_v0 }
 0x3d1   : > { %1313 = vadd.xlane.f32.xlu0 %v1312_v6  ;;  %v1848_v40 = vpop.eup %1847 }
 0x3d2   : > { %v1260_v27 = vpop.xlane.xlu0 %1259  ;;  %v1422_v41 = vpack.c.bf16 %v1366_v22, %v1364_v13  ;;  %v1421_v62 = vpack.c.bf16 %v1365_v16, %v1363_v60  ;;  %v1368_v47 = vmul.f32 %v1848_v40, %v2530_v52  ;;  %v1367_v57 = vmul.f32 %v1848_v40, %v2528_v11 }
 0x3d3   : > { %1853 = vrcp.f32 %v1260_v27 }
 0x3d4   : > { %1453 = vmatprep.subr.bf16.mxu0 %v1422_v41 }
 0x3d5   : > { %v1850_v37 = vpop.eup %1849  ;;  %1454 = vmatpush1.bf16.xpose.msra.mxu0 %v1421_v62 }
 0x3d6   : > { %v1263_v55 = vpop.xlane.xlu1 %1262  ;;  %v1370_v14 = vmul.f32 %v1850_v37, %v2538_v24  ;;  %v1369_v4 = vmul.f32 %v1850_v37, %v2536_v30 }
 0x3d7   : > { %1855 = vrcp.f32 %v1263_v55 }
 0x3d8   : > { %v1424_v0 = vpack.c.bf16 %v1370_v14, %v1368_v47  ;;  %v1423_v31 = vpack.c.bf16 %v1369_v4, %v1367_v57 }
 0x3d9   : > { %v1852_v49 = vpop.eup %1851 }
 0x3da   : > { %v1266_v28 = vpop.xlane.xlu0 %1265  ;;  %1455 = vmatprep.subr.bf16.mxu0 %v1424_v0  ;;  %v1372_v24 = vmul.f32 %v1852_v49, %v2546_v26  ;;  %v1371_v46 = vmul.f32 %v1852_v49, %v2544_v33  ;;  %v2914_v49 = vld [vmem:[#allocation12_spill] sm:$0xff] }
 0x3db   : > { %1857 = vrcp.f32 %v1266_v28 }
 0x3dd   : > { %v1854_v58 = vpop.eup %1853  ;;  %1456 = vmatpush1.bf16.xpose.msra.mxu0 %v1423_v31  ;;  %v2913_v31 = vld [vmem:[#allocation10_spill] sm:$0xff] }
 0x3de   : > { %v1269_v52 = vpop.xlane.xlu1 %1268  ;;  %v1374_v30 = vmul.f32 %v1854_v58, %v2554_v5  ;;  %v1373_v11 = vmul.f32 %v1854_v58, %v2552_v36  ;;  %447 = vperm.xlu1 %1694, %v443_v54   ;;  %v444_v36 = vld [vmem:[%s2835_s6 + $0x8] sm:$0xff]  ;;  %v2915_v54 = vld [vmem:[#allocation11_spill] sm:$0xff]  ;;  %v2916_v58 = vld [vmem:[#allocation9_spill] sm:$0xff] }
 0x3df   : > { %1859 = vrcp.f32 %v1269_v52 }
 0x3e0   : > { %v1426_v19 = vpack.c.bf16 %v1374_v30, %v1372_v24  ;;  %v1425_v53 = vpack.c.bf16 %v1373_v11, %v1371_v46 }
 0x3e1   : > { %v1856_v26 = vpop.eup %1855 }
 0x3e2   : > { %v1272_v44 = vpop.xlane.xlu0 %1271  ;;  %1457 = vmatprep.subr.bf16.mxu0 %v1426_v19  ;;  %v1376_v23 = vmul.f32 %v1856_v26, %v2562_v8  ;;  %v1375_v10 = vmul.f32 %v1856_v26, %v2560_v39  ;;  %v2917_v19 = vld [vmem:[#allocation14_spill] sm:$0xff] }
 0x3e3   : > { %1861 = vrcp.f32 %v1272_v44 }
 0x3e5   : > { %v1858_v33 = vpop.eup %1857  ;;  %1458 = vmatpush1.bf16.xpose.msra.mxu0 %v1425_v53 }
 0x3e6   : > { %v1275_v5 = vpop.xlane.xlu1 %1274  ;;  %v1378_v21 = vmul.f32 %v1858_v33, %v2570_v2  ;;  %v1377_v59 = vmul.f32 %v1858_v33, %v2568_v42 }
 0x3e7   : > { %452 = vperm.xlu0 %1693, %v444_v36   ;;  %1863 = vrcp.f32 %v1275_v5  ;;  %v2918_v36 = vld [vmem:[#allocation13_spill] sm:$0xff] }
 0x3e8   : > { %v1428_v18 = vpack.c.bf16 %v1378_v21, %v1376_v23  ;;  %v1427_v3 = vpack.c.bf16 %v1377_v59, %v1375_v10 }
 0x3e9   : > { %v1860_v13 = vpop.eup %1859 }
 0x3ea   : > { %v1278_v6 = vpop.xlane.xlu0 %1277  ;;  %1459 = vmatprep.subr.bf16.mxu0 %v1428_v18  ;;  %v1380_v16 = vmul.f32 %v1860_v13, %v2578_v29  ;;  %v1379_v42 = vmul.f32 %v1860_v13, %v2576_v45  ;;  %v2920_v13 = vld [vmem:[#allocation16_spill] sm:$0xff] }
 0x3eb   : > { %1865 = vrcp.f32 %v1278_v6 }
 0x3ed   : > { %v1862_v22 = vpop.eup %1861  ;;  %1460 = vmatpush1.bf16.xpose.msra.mxu0 %v1427_v3  ;;  %v2919_v3 = vld [vmem:[#allocation17_spill] sm:$0xff] }
 0x3ee   : > { %v1281_v60 = vpop.xlane.xlu1 %1280  ;;  %v1382_v8 = vmul.f32 %v1862_v22, %v2586_v32  ;;  %v1381_v2 = vmul.f32 %v1862_v22, %v2584_v48 }
 0x3ef   : > { %1867 = vrcp.f32 %v1281_v60 }
 0x3f0   : > { %v1430_v27 = vpack.c.bf16 %v1382_v8, %v1380_v16  ;;  %v1429_v39 = vpack.c.bf16 %v1381_v2, %v1379_v42  ;;  %v2922_v42 = vld [vmem:[#allocation19_spill] sm:$0xff] }
 0x3f1   : > { %v1864_v62 = vpop.eup %1863 }
 0x3f2   : > { %v1284_v41 = vpop.xlane.xlu0 %1283  ;;  %1461 = vmatprep.subr.bf16.mxu0 %v1430_v27  ;;  %v1384_v55 = vmul.f32 %v1864_v62, %v2594_v35  ;;  %v1383_v48 = vmul.f32 %v1864_v62, %v2592_v51  ;;  %v2924_v62 = vld [vmem:[#allocation20_spill] sm:$0xff] }
 0x3f3   : > { %1869 = vrcp.f32 %v1284_v41 }
 0x3f5   : > { %v1866_v40 = vpop.eup %1865  ;;  %1462 = vmatpush1.bf16.xpose.msra.mxu0 %v1429_v39  ;;  %v2923_v39 = vld [vmem:[#allocation21_spill] sm:$0xff] }
 0x3f6   : > { %v1287_v37 = vpop.xlane.xlu1 %1286  ;;  %v1386_v29 = vmul.f32 %v1866_v40, %v2602_v38  ;;  %v1385_v32 = vmul.f32 %v1866_v40, %v2600_v56 }
 0x3f7   : > { %1871 = vrcp.f32 %v1287_v37  ;;  %v2925_v37 = vld [vmem:[#allocation18_spill] sm:$0xff] }
 0x3f8   : > { %v1432_v47 = vpack.c.bf16 %v1386_v29, %v1384_v55  ;;  %v1431_v45 = vpack.c.bf16 %v1385_v32, %v1383_v48 }
 0x3f9   : > { %v1868_v4 = vpop.eup %1867 }
 0x3fa   : > { %v1290_v14 = vpop.xlane.xlu0 %1289  ;;  %1463 = vmatprep.subr.bf16.mxu0 %v1432_v47  ;;  %v1388_v28 = vmul.f32 %v1868_v4, %v2913_v31  ;;  %v1387_v56 = vmul.f32 %v1868_v4, %v2916_v58 }
 0x3fb   : > { %1873 = vrcp.f32 %v1290_v14 }
 0x3fd   : > { %v1870_v57 = vpop.eup %1869  ;;  %1464 = vmatpush1.bf16.xpose.msra.mxu0 %v1431_v45 }
 0x3fe   : > { %v1293_v0 = vpop.xlane.xlu1 %1292  ;;  %v1390_v35 = vmul.f32 %v1870_v57, %v2914_v49  ;;  %v1389_v38 = vmul.f32 %v1870_v57, %v2915_v54  ;;  %v2926_v57 = vld [vmem:[#allocation23_spill] sm:$0xff]  ;;  %v2927_v49 = vld [vmem:[#allocation22_spill] sm:$0xff] }
 0x3ff   : > { %1875 = vrcp.f32 %v1293_v0 }
 0x400   : > { %v1434_v52 = vpack.c.bf16 %v1390_v35, %v1388_v28  ;;  %v1433_v51 = vpack.c.bf16 %v1389_v38, %v1387_v56 }
 0x401   : > { %v1872_v30 = vpop.eup %1871 }
 0x402   : > { %v1296_v24 = vpop.xlane.xlu0 %1295  ;;  %1465 = vmatprep.subr.bf16.mxu0 %v1434_v52  ;;  %v1392_v53 = vmul.f32 %v1872_v30, %v2917_v19  ;;  %v1391_v33 = vmul.f32 %v1872_v30, %v2918_v36 }
 0x403   : > { %1877 = vrcp.f32 %v1296_v24 }
 0x405   : > { %v1874_v11 = vpop.eup %1873  ;;  %1466 = vmatpush1.bf16.xpose.msra.mxu0 %v1433_v51 }
 0x406   : > { %v1299_v46 = vpop.xlane.xlu1 %1298  ;;  %v1394_v44 = vmul.f32 %v1874_v11, %v2634_v17  ;;  %v1393_v26 = vmul.f32 %v1874_v11, %v2632_v7  ;;  %v2921_v17 = vld [vmem:[#allocation15_spill] sm:$0xff] }
 0x407   : > { %1879 = vrcp.f32 %v1299_v46 }
 0x408   : > { %v1436_v5 = vpack.c.bf16 %v1394_v44, %v1392_v53  ;;  %v1435_v23 = vpack.c.bf16 %v1393_v26, %v1391_v33 }
 0x409   : > { %v1876_v59 = vpop.eup %1875 }
 0x40a   : > { %v1302_v21 = vpop.xlane.xlu0 %1301  ;;  %1467 = vmatprep.subr.bf16.mxu0 %v1436_v5  ;;  %v1396_v18 = vmul.f32 %v1876_v59, %v2642_v1  ;;  %v1395_v60 = vmul.f32 %v1876_v59, %v2921_v17 }
 0x40b   : > { %1881 = vrcp.f32 %v1302_v21 }
 0x40d   : > { %v1878_v10 = vpop.eup %1877  ;;  %1468 = vmatpush1.bf16.xpose.msra.mxu0 %v1435_v23 }
 0x40e   : > { %v1398_v6 = vmul.f32 %v1878_v10, %v2919_v3  ;;  %v1397_v22 = vmul.f32 %v1878_v10, %v2920_v13  ;;  %v1305_v32 = vpop.xlane.xlu1 %1304 }
 0x40f   : > { %1883 = vrcp.f32 %v1305_v32 }
 0x410   : > { %v1438_v7 = vpack.c.bf16 %v1398_v6, %v1396_v18  ;;  %v1437_v16 = vpack.c.bf16 %v1397_v22, %v1395_v60 }
 0x411   : > { %v1880_v8 = vpop.eup %1879 }
 0x412   : > { %1469 = vmatprep.subr.bf16.mxu0 %v1438_v7  ;;  %v1400_v27 = vmul.f32 %v1880_v8, %v2922_v42  ;;  %v1399_v1 = vmul.f32 %v1880_v8, %v2925_v37 }
 0x415   : > { %v1882_v2 = vpop.eup %1881  ;;  %1470 = vmatpush1.bf16.xpose.msra.mxu0 %v1437_v16 }
 0x416   : > { %v1402_v41 = vmul.f32 %v1882_v2, %v2923_v39  ;;  %v1401_v40 = vmul.f32 %v1882_v2, %v2924_v62 }
 0x418   : > { %v1440_v55 = vpack.c.bf16 %v1402_v41, %v1400_v27  ;;  %v1439_v29 = vpack.c.bf16 %v1401_v40, %v1399_v1 }
 0x419   : > { %v1884_v14 = vpop.eup %1883 }
 0x41a   : > { %1471 = vmatprep.subr.bf16.mxu0 %v1440_v55  ;;  %v1404_v0 = vmul.f32 %v1884_v14, %v2926_v57  ;;  %v1403_v35 = vmul.f32 %v1884_v14, %v2927_v49 }
 0x41d   : > { %1472 = vmatpush1.bf16.xpose.msra.mxu0 %v1439_v29 }
 0x456   : > { %v1308_v48 = vpop.xlane.xlu0 %1307 }
 0x457   : > { %1885 = vrcp.f32 %v1308_v48 }
 0x45a   : > { %v1311_v47 = vpop.xlane.xlu1 %1310 }
 0x45b   : > { %1887 = vrcp.f32 %v1311_v47 }
 0x45e   : > { %v1314_v45 = vpop.xlane.xlu0 %1313  ;;  %v448_v28 = vpop.permute.xlu1 %447 }
 0x45f   : > { %1889 = vrcp.f32 %v1314_v45  ;;  %v498_v56 = vadd.f32 %v2727_v43, %v448_v28  ;;  %v500_v52 = vadd.f32 %v2729_v63, %v448_v28 }
 0x461   : > { %v1886_v4 = vpop.eup %1885 }
 0x462   : > { %v1406_v31 = vmul.f32 %v1886_v4, %v2692_v12  ;;  %v1405_v54 = vmul.f32 %v1886_v4, %v2690_v9 }
 0x464   : > { %v1442_v38 = vpack.c.bf16 %v1406_v31, %v1404_v0  ;;  %v1441_v58 = vpack.c.bf16 %v1405_v54, %v1403_v35 }
 0x465   : > { %v1888_v24 = vpop.eup %1887 }
 0x466   : > { %v453_v51 = vpop.permute.xlu0 %452  ;;  %1473 = vmatprep.subr.bf16.mxu0 %v1442_v38  ;;  %v1408_v9 = vmul.f32 %v1888_v24, %v2702_v20  ;;  %v1407_v43 = vmul.f32 %v1888_v24, %v2700_v50 }
 0x467   : > { %v502_v30 = vadd.f32 %v2731_v25, %v453_v51  ;;  %v504_v11 = vadd.f32 %v2733_v61, %v453_v51  ;;  %1474 = vmatpush1.bf16.xpose.msra.mxu0 %v1441_v58  ;;  %v1489_v25 = vstv %s1488_s27 }
 0x469   : > { %v1890_v12 = vpop.eup %1889  ;;  %v1411_v46 = vpack.c.bf16 %v502_v30, %v498_v56  ;;  %v1412_v19 = vpack.c.bf16 %v504_v11, %v500_v52 }
 0x46a   : > { %v1410_v53 = vmul.f32 %v1890_v12, %v2708_v15  ;;  %v1409_v63 = vmul.f32 %v1890_v12, %v2706_v34 }
 0x46b   : > { %1477 = vmatprep.mubr.bf16.mxu0 %v1412_v19 }
 0x46c   : > { %v1444_v44 = vpack.c.bf16 %v1410_v53, %v1408_v9  ;;  %v1443_v26 = vpack.c.bf16 %v1409_v63, %v1407_v43 }
 0x46e   : > { %1475 = vmatprep.subr.bf16.mxu0 %v1444_v44 }
 0x46f   : > { %1476 = vmatpush1.bf16.xpose.msra.mxu0 %v1443_v26 }
 0x476   : > { %1478 = vmatmul.mubr.bf16.vlgmr.msra.gmra.mrb[8].mxu0 %v1411_v46 }
 0x549   : > { %v1479_v20 = vpop.f32.mrb[8].mxu0 }
 0x54a   : > { %v1490_v61 = vmul.f32 %v1489_v25, %v1479_v20  ;;  %v1481_v15 = vpop.f32.mrb[9].mxu0 }
 0x54b   : > { %v1491_v50 = vmul.f32 %v1489_v25, %v1481_v15  ;;  %v1483_v34 = vpop.f32.mrb[10].mxu0 }
 0x54c   : > { %1494 = vst [vmem:[%s324_s11] sm:$0xff] %v1490_v61  ;;  %v1492_v36 = vmul.f32 %v1489_v25, %v1483_v34  ;;  %v1485_v33 = vpop.f32.mrb[11].mxu0 }
 0x54d   : > { %1495 = vst [vmem:[%s324_s11 + $0x8] sm:$0xff] %v1491_v50  ;;  %v1493_v5 = vmul.f32 %v1489_v25, %v1485_v33 }
 0x54e   : > { %1496 = vst [vmem:[%s324_s11 + $0x10] sm:$0xff] %v1492_v36 }
 0x54f   : > { %1497 = vst [vmem:[%s324_s11 + $0x18] sm:$0xff] %v1493_v5 }
 0x550   : > { %1934 = shalt.err (!%p1931_p2)
}
 0x551   : > { %s1935_s25 = scalar_lea.hbm %s2785_s13, 512  ;;  %s1939_s11 = scalar_lea.hbm %s2837_s8, 1024 }
 0x552   : > { %p1936_p4 = scmp.ne.s32.totalorder %s2785_s13, %s1935_s25  ;;  %p1940_p9 = scmp.lt.u32.totalorder %s2785_s13, %s2837_s8 }
 0x553   : > { %p1941_p1 = scmp.lt.u32.totalorder %s1939_s11, %s1935_s25  ;;  %p1943_p6 = scmp.lt.u32.totalorder %s1935_s25, %s2785_s13 }
 0x554   : > { %p1937_p5 = pnand %p1936_p4, %p2928_p11 }
 0x555   : > { %p1942_p3 = por %p1941_p1, %p1940_p9 }
 0x556   : > { %p1938_p7 = pneg %p1937_p5 }
 0x557   : > { %p1944_p12 = por %p1943_p6, %p1942_p3 }
 0x559   : > { %p1945_p13 = pnand %p1944_p12, %p1938_p7 }
 0x55b   : > { %1948 = shalt.err (!%p1945_p13)
}
 0x55c   : > { %s1995_s14 = smov 256   ;;  %s1996_s16 = smov 16  }
 0x55d   : > { %1643 = dma.vmem_to_hbm [thread:$0]  (%p2928_p11), %s2780_s17, 512, %s2785_s13, %s1499_s7, %s1995_s14, %s1995_s14, %s1996_s16  }
 0x55e PF: > { %s1527_s22 = sand.u32 1, %s1975_s29   ;;  %p2929_p8 = scmp.ne.s32.totalorder %s2869_s19, 0 }
 0x55f   : > { %p2930_p10 = scmp.ge.s32.totalorder %s1987_s10, 2  ;;  %s1528_s23 = scalar_lea.sflag [#allocation5], %s1527_s22 }
 0x561   : > { %p1650_p0 = pnand %p2930_p10, %p2929_p8 }
 0x563   : > { %1970 = dma.done.wait (!%p1650_p0), %s1528_s23, 512  }
 0x564   : > { %1972 = vsyncadd (!%p1650_p0), %s1528_s23, 4294966784  ;;  %p22_p2 = scmp.ge.s32.totalorder %s2070_s12, 4   ;;  %s2931_s29 = smov %s1979_s30 }
 0x565   : > { %s2932_s30 = smov %s1983_s9  ;;  %s2933_s9 = smov %s2082_s15 }
 0x566   : > { %s2934_s10 = smov %s2070_s12  ;;  %24 = sbr.rel (!%p22_p2) target bundleno = 7 (0x7), region = 97 }
 0x56d   :  { %1533 = vsyncpa [#allocation4], 1 }
 0x56e   :  { %1535 = vsyncpa [#allocation4 + $0x1], 1 }
 0x56f   :  { %1536 = vsyncpa [#allocation5], 1 }
 0x570   :  { %1538 = vsyncpa [#allocation5 + $0x1], 1 }

</bundles_post_ra>
